<compile_context>
chip_gen: v6e
topology: v6e:2x2x1
jax: 0.10.0
libtpu: 0.0.40
codegen_flags: <defaults>
</compile_context>

<pallas_src>
import math

import jax
import jax.numpy as jnp
from jax.experimental import pallas as pl
from jax.experimental.pallas import tpu as pltpu

C_HID = 16          # hidden channels
KSIZE = 3
NEG_SLOPE = 0.2
MAX_LANES = 16384   # cap on TB*L lanes per grid step (VMEM headroom)
MAX_TB = 128        # cap on batch elements per grid step


def _leaky(v):
    return jnp.where(v > 0, v, NEG_SLOPE * v)


def generator_kernel(x_ref, y_ref, mnf_ref, mnl_ref, w1_ref, b1_ref,
                     w2_ref, b2_ref, w3_ref, b3_ref, o_ref):
    # x_ref / y_ref / o_ref : (1, TB*L)   TB batch segments of length L on lanes
    # mnf_ref / mnl_ref     : (1, TB*L)   0.0 at segment first / last lane, else 1.0
    # w1_ref : (3, 16, 1)   head taps  [k, cout, 1]
    # b1_ref : (16, 1)
    # w2_ref : (3, 16, 16)  body taps  [k, cout, cin]
    # b2_ref : (16, 1)
    # w3_ref : (8, 16)      tail taps  [k (3, zero-padded to 8), cin]
    # b3_ref : (1,) f32 in SMEM
    f32 = jnp.float32
    x = x_ref[...]                       # (1, N)
    mnf = mnf_ref[...]                   # (1, N)
    mnl = mnl_ref[...]
    n = x.shape[-1]

    # Conv halo neighbours: lane roll (XLU) + boundary mask so the shift never
    # leaks across batch segments (equivalent to the conv zero padding).
    x_m = pltpu.roll(x, 1, axis=1) * mnf          # x[b, l-1]
    x_p = pltpu.roll(x, n - 1, axis=1) * mnl      # x[b, l+1]

    # ---- head: Conv1d(1->16, k3, p1) + LeakyReLU  (VPU outer product) ------
    w1 = w1_ref[...]                              # (3, 16, 1)
    h1 = _leaky(w1[0] * x_m + w1[1] * x + w1[2] * x_p + b1_ref[...])   # (16, N)

    # ---- body: Conv1d(16->16, k3, p1) + LeakyReLU  (batched MXU matmuls) ---
    h1_m = pltpu.roll(h1, 1, axis=1) * mnf
    h1_p = pltpu.roll(h1, n - 1, axis=1) * mnl
    acc = jnp.dot(w2_ref[0], h1_m, preferred_element_type=f32)
    acc = acc + jnp.dot(w2_ref[1], h1, preferred_element_type=f32)
    acc = acc + jnp.dot(w2_ref[2], h1_p, preferred_element_type=f32)
    h2 = _leaky(acc + b2_ref[...])                                     # (16, N)

    # ---- tail: Conv1d(16->1, k3, p1) + residual -----------------------------
    # Per-tap channel reductions as one (8,16)@(16,N) MXU matmul, then shift
    # the cheap (1, N) partials and add the residual.
    t = jnp.dot(w3_ref[...], h2, preferred_element_type=f32)           # (8, N)
    out = (pltpu.roll(t[0:1, :], 1, axis=1) * mnf
           + t[1:2, :]
           + pltpu.roll(t[2:3, :], n - 1, axis=1) * mnl
           + b3_ref[0] + y_ref[...])
    o_ref[...] = out                     # single lane-dense (1, TB*L) store


def _pick_tb(n_batch, length):
    """Batch elements per grid step: lane-aligned, VMEM-bounded, grid >= 2."""
    lane_align = 128 // math.gcd(length, 128)     # keeps TB*L a multiple of 128
    tb = lane_align
    while (tb < MAX_TB
           and 2 * tb * length <= MAX_LANES
           and -(-n_batch // (2 * tb)) >= 2):     # keep >= 2 grid steps (v7x 2 TCs)
        tb *= 2
    return tb


def generator_forward(x, y, params):
    """x, y: (N, 1, L) float32 in PyTorch NCW layout. Returns (N, 1, L)."""
    w1, b1, w2, b2, w3, b3 = params     # PyTorch shapes:
    # w1: (16, 1, 3)  b1: (16,)   w2: (16, 16, 3)  b2: (16,)
    # w3: (1, 16, 3)  b3: (1,)
    n, _, length = x.shape

    # One-time host-side weight re-layout into kernel-friendly forms.
    w1k = jnp.transpose(w1, (2, 0, 1)).astype(jnp.float32)            # (3,16,1)
    b1c = b1.reshape(C_HID, 1).astype(jnp.float32)                    # (16,1)
    w2k = jnp.transpose(w2, (2, 0, 1)).astype(jnp.float32)            # (3,16,16)
    b2c = b2.reshape(C_HID, 1).astype(jnp.float32)                    # (16,1)
    w3t = jnp.transpose(w3.reshape(C_HID, KSIZE).astype(jnp.float32),
                        (1, 0))                                       # (3,16)
    w3k = jnp.concatenate(
        [w3t, jnp.zeros((8 - KSIZE, C_HID), jnp.float32)], axis=0)    # (8,16)
    b3c = b3.reshape(1).astype(jnp.float32)                           # (1,)

    tb = _pick_tb(n, length)
    n_pad = (-n) % tb
    npad = n + n_pad

    x2 = x.reshape(n, length).astype(jnp.float32)
    y2 = y.reshape(n, length).astype(jnp.float32)
    if n_pad:
        x2 = jnp.pad(x2, ((0, n_pad), (0, 0)))
        y2 = jnp.pad(y2, ((0, n_pad), (0, 0)))

    # Flatten TB batch rows onto the lane axis (row-major reshape is free):
    # lane p of block g holds batch element g*tb + p//L at position p%L.
    n_lanes = tb * length
    xf = x2.reshape(1, npad * length)
    yf = y2.reshape(1, npad * length)

    pos = jnp.arange(n_lanes, dtype=jnp.int32) % length
    mnf = (pos != 0).astype(jnp.float32).reshape(1, n_lanes)
    mnl = (pos != length - 1).astype(jnp.float32).reshape(1, n_lanes)

    out = pl.pallas_call(
        generator_kernel,
        out_shape=jax.ShapeDtypeStruct((1, npad * length), jnp.float32),
        grid_spec=pltpu.PrefetchScalarGridSpec(
            num_scalar_prefetch=0,
            grid=(npad // tb,),
            in_specs=[
                pl.BlockSpec((1, n_lanes), lambda g: (0, g)),               # x
                pl.BlockSpec((1, n_lanes), lambda g: (0, g)),               # y
                pl.BlockSpec((1, n_lanes), lambda g: (0, 0)),               # mnf
                pl.BlockSpec((1, n_lanes), lambda g: (0, 0)),               # mnl
                pl.BlockSpec((KSIZE, C_HID, 1), lambda g: (0, 0, 0)),       # w1
                pl.BlockSpec((C_HID, 1), lambda g: (0, 0)),                 # b1
                pl.BlockSpec((KSIZE, C_HID, C_HID), lambda g: (0, 0, 0)),   # w2
                pl.BlockSpec((C_HID, 1), lambda g: (0, 0)),                 # b2
                pl.BlockSpec((8, C_HID), lambda g: (0, 0)),                 # w3
                pl.BlockSpec(memory_space=pltpu.MemorySpace.SMEM),          # b3
            ],
            out_specs=pl.BlockSpec((1, n_lanes), lambda g: (0, g)),
        ),
        compiler_params=pltpu.CompilerParams(
            dimension_semantics=("parallel",)),
    )(xf, yf, mnf, mnl, w1k, b1c, w2k, b2c, w3k, b3c)

    return out.reshape(npad, length)[:n].reshape(n, 1, length)


# -------------------- pure-JAX reference for verification --------------------
def _conv1d_ref(x, w, b):
    # x: (N, Cin, L), w: (Cout, Cin, K), b: (Cout,)  -> (N, Cout, L)
    L = x.shape[-1]
    K = w.shape[-1]
    xp = jnp.pad(x, ((0, 0), (0, 0), (1, 1)))
    out = sum(jnp.einsum('ncl,oc->nol', xp[:, :, k:k + L], w[:, :, k],
                         precision=jax.lax.Precision.HIGHEST)
              for k in range(K))
    return out + b.reshape(1, -1, 1)


def _generator_ref(x, y, params):
    w1, b1, w2, b2, w3, b3 = params
    h = _leaky(_conv1d_ref(x, w1, b1))
    h = _leaky(_conv1d_ref(h, w2, b2))
    h = _conv1d_ref(h, w3, b3)
    return h + y


def make_params(key):
    ks = jax.random.split(key, 6)
    w1 = 0.3 * jax.random.normal(ks[0], (C_HID, 1, KSIZE), jnp.float32)
    b1 = 0.1 * jax.random.normal(ks[1], (C_HID,), jnp.float32)
    w2 = 0.3 * jax.random.normal(ks[2], (C_HID, C_HID, KSIZE), jnp.float32)
    b2 = 0.1 * jax.random.normal(ks[3], (C_HID,), jnp.float32)
    w3 = 0.3 * jax.random.normal(ks[4], (1, C_HID, KSIZE), jnp.float32)
    b3 = 0.1 * jax.random.normal(ks[5], (1,), jnp.float32)
    return (w1, b1, w2, b2, w3, b3)


if __name__ == "__main__":
    key = jax.random.PRNGKey(0)
    kx, ky, kp = jax.random.split(key, 3)

    N, L = 16, 128   # -> TB=8, grid=2 (both v7x TensorCores busy), 1024 lanes/step
    x = jax.random.normal(kx, (N, 1, L), jnp.float32)
    y = jax.random.normal(ky, (N, 1, L), jnp.float32)
    params = make_params(kp)

    out = generator_forward(x, y, params)
    out = jax.block_until_ready(out)

    ref = _generator_ref(x, y, params)
    assert out.shape == (N, 1, L)
    max_err = float(jnp.max(jnp.abs(out - ref)))
    assert jnp.allclose(out, ref, atol=1e-4, rtol=1e-4), \
        f"mismatch vs reference (max err {max_err})"
    print("KERNEL_OK")
</pallas_src>

<mosaic_0001>
module attributes {stable_mosaic.version = 11 : i64} {
  func.func @generator_kernel(%arg0: i32, %arg1: memref<1x1024xf32, #tpu.memory_space<vmem>>, %arg2: memref<1x1024xf32, #tpu.memory_space<vmem>>, %arg3: memref<1x1024xf32, #tpu.memory_space<vmem>>, %arg4: memref<1x1024xf32, #tpu.memory_space<vmem>>, %arg5: memref<3x16x1xf32, #tpu.memory_space<vmem>>, %arg6: memref<16x1xf32, #tpu.memory_space<vmem>>, %arg7: memref<3x16x16xf32, #tpu.memory_space<vmem>>, %arg8: memref<16x1xf32, #tpu.memory_space<vmem>>, %arg9: memref<8x16xf32, #tpu.memory_space<vmem>>, %arg10: memref<1xf32, #tpu.memory_space<smem>>, %arg11: memref<1x1024xf32, #tpu.memory_space<vmem>>) attributes {dimension_semantics = [#tpu.dimension_semantics<parallel>], iteration_bounds = array<i64: 2>, scalar_prefetch = 0 : i64, scratch_operands = 0 : i64, tpu.core_type = #tpu.core_type<tc>, window_params = [{transform_indices = @transform_0, window_bounds = array<i64: 1, 1024>}, {transform_indices = @transform_1, window_bounds = array<i64: 1, 1024>}, {pipeline_mode = #tpu.pipeline_mode<synchronous>, transform_indices = @transform_2, window_bounds = array<i64: 1, 1024>}, {pipeline_mode = #tpu.pipeline_mode<synchronous>, transform_indices = @transform_3, window_bounds = array<i64: 1, 1024>}, {pipeline_mode = #tpu.pipeline_mode<synchronous>, transform_indices = @transform_4, window_bounds = array<i64: 3, 16, 1>}, {pipeline_mode = #tpu.pipeline_mode<synchronous>, transform_indices = @transform_5, window_bounds = array<i64: 16, 1>}, {pipeline_mode = #tpu.pipeline_mode<synchronous>, transform_indices = @transform_6, window_bounds = array<i64: 3, 16, 16>}, {pipeline_mode = #tpu.pipeline_mode<synchronous>, transform_indices = @transform_7, window_bounds = array<i64: 16, 1>}, {pipeline_mode = #tpu.pipeline_mode<synchronous>, transform_indices = @transform_8, window_bounds = array<i64: 8, 16>}, {transform_indices = @transform_9, window_bounds = array<i64: 1>}, {transform_indices = @transform_10, window_bounds = array<i64: 1, 1024>}]} {
    %c0 = arith.constant 0 : index
    %c0_0 = arith.constant 0 : index
    %0 = vector.load %arg1[%c0, %c0_0] : memref<1x1024xf32, #tpu.memory_space<vmem>>, vector<1x1024xf32>
    %c0_1 = arith.constant 0 : index
    %c0_2 = arith.constant 0 : index
    %1 = vector.load %arg3[%c0_1, %c0_2] : memref<1x1024xf32, #tpu.memory_space<vmem>>, vector<1x1024xf32>
    %c0_3 = arith.constant 0 : index
    %c0_4 = arith.constant 0 : index
    %2 = vector.load %arg4[%c0_3, %c0_4] : memref<1x1024xf32, #tpu.memory_space<vmem>>, vector<1x1024xf32>
    %c1_i32 = arith.constant 1 : i32
    %3 = tpu.dynamic_rotate %0 by %c1_i32 dim 1 : vector<1x1024xf32>, i32 -> vector<1x1024xf32>
    %4 = arith.mulf %3, %1 : vector<1x1024xf32>
    %c1023_i32 = arith.constant 1023 : i32
    %5 = tpu.dynamic_rotate %0 by %c1023_i32 dim 1 : vector<1x1024xf32>, i32 -> vector<1x1024xf32>
    %6 = arith.mulf %5, %2 : vector<1x1024xf32>
    %c0_5 = arith.constant 0 : index
    %c0_6 = arith.constant 0 : index
    %c0_7 = arith.constant 0 : index
    %7 = vector.load %arg5[%c0_5, %c0_6, %c0_7] : memref<3x16x1xf32, #tpu.memory_space<vmem>>, vector<3x16x1xf32>
    %8 = vector.extract_strided_slice %7 {offsets = [0, 0, 0], sizes = [1, 16, 1], strides = [1, 1, 1]} : vector<3x16x1xf32> to vector<1x16x1xf32>
    %9 = vector.shape_cast %8 : vector<1x16x1xf32> to vector<16x1xf32>
    %10 = vector.broadcast %9 : vector<16x1xf32> to vector<16x1024xf32>
    %11 = vector.broadcast %4 : vector<1x1024xf32> to vector<16x1024xf32>
    %12 = arith.mulf %10, %11 : vector<16x1024xf32>
    %13 = vector.extract_strided_slice %7 {offsets = [1, 0, 0], sizes = [1, 16, 1], strides = [1, 1, 1]} : vector<3x16x1xf32> to vector<1x16x1xf32>
    %14 = vector.shape_cast %13 : vector<1x16x1xf32> to vector<16x1xf32>
    %15 = vector.broadcast %14 : vector<16x1xf32> to vector<16x1024xf32>
    %16 = vector.broadcast %0 : vector<1x1024xf32> to vector<16x1024xf32>
    %17 = arith.mulf %15, %16 : vector<16x1024xf32>
    %18 = arith.addf %12, %17 : vector<16x1024xf32>
    %19 = vector.extract_strided_slice %7 {offsets = [2, 0, 0], sizes = [1, 16, 1], strides = [1, 1, 1]} : vector<3x16x1xf32> to vector<1x16x1xf32>
    %20 = vector.shape_cast %19 : vector<1x16x1xf32> to vector<16x1xf32>
    %21 = vector.broadcast %20 : vector<16x1xf32> to vector<16x1024xf32>
    %22 = vector.broadcast %6 : vector<1x1024xf32> to vector<16x1024xf32>
    %23 = arith.mulf %21, %22 : vector<16x1024xf32>
    %24 = arith.addf %18, %23 : vector<16x1024xf32>
    %c0_8 = arith.constant 0 : index
    %c0_9 = arith.constant 0 : index
    %25 = vector.load %arg6[%c0_8, %c0_9] : memref<16x1xf32, #tpu.memory_space<vmem>>, vector<16x1xf32>
    %26 = vector.broadcast %25 : vector<16x1xf32> to vector<16x1024xf32>
    %27 = arith.addf %24, %26 : vector<16x1024xf32>
    %cst = arith.constant 0.000000e+00 : f32
    %28 = vector.broadcast %cst : f32 to vector<16x1024xf32>
    %29 = arith.cmpf ogt, %27, %28 : vector<16x1024xf32>
    %cst_10 = arith.constant 2.000000e-01 : f32
    %30 = vector.broadcast %cst_10 : f32 to vector<16x1024xf32>
    %31 = arith.mulf %30, %27 : vector<16x1024xf32>
    %32 = arith.select %29, %27, %31 : vector<16x1024xi1>, vector<16x1024xf32>
    %c1_i32_11 = arith.constant 1 : i32
    %33 = tpu.dynamic_rotate %32 by %c1_i32_11 dim 1 : vector<16x1024xf32>, i32 -> vector<16x1024xf32>
    %34 = vector.broadcast %1 : vector<1x1024xf32> to vector<16x1024xf32>
    %35 = arith.mulf %33, %34 : vector<16x1024xf32>
    %c1023_i32_12 = arith.constant 1023 : i32
    %36 = tpu.dynamic_rotate %32 by %c1023_i32_12 dim 1 : vector<16x1024xf32>, i32 -> vector<16x1024xf32>
    %37 = vector.broadcast %2 : vector<1x1024xf32> to vector<16x1024xf32>
    %38 = arith.mulf %36, %37 : vector<16x1024xf32>
    %c0_13 = arith.constant 0 : index
    %c0_14 = arith.constant 0 : index
    %c0_15 = arith.constant 0 : index
    %39 = vector.load %arg7[%c0_13, %c0_14, %c0_15] : memref<3x16x16xf32, #tpu.memory_space<vmem>>, vector<1x16x16xf32>
    %40 = vector.shape_cast %39 : vector<1x16x16xf32> to vector<16x16xf32>
    %cst_16 = arith.constant dense<0.000000e+00> : vector<16x1024xf32>
    %41 = tpu.matmul %40, %35, %cst_16 {dimension_numbers = #tpu.dot_dimension_numbers<[1], [0], [0], [1], [0, 0, 1, 1], [], []>} : vector<16x16xf32>, vector<16x1024xf32>, vector<16x1024xf32> -> vector<16x1024xf32>
    %c1 = arith.constant 1 : index
    %c0_17 = arith.constant 0 : index
    %c0_18 = arith.constant 0 : index
    %42 = vector.load %arg7[%c1, %c0_17, %c0_18] : memref<3x16x16xf32, #tpu.memory_space<vmem>>, vector<1x16x16xf32>
    %43 = vector.shape_cast %42 : vector<1x16x16xf32> to vector<16x16xf32>
    %cst_19 = arith.constant dense<0.000000e+00> : vector<16x1024xf32>
    %44 = tpu.matmul %43, %32, %cst_19 {dimension_numbers = #tpu.dot_dimension_numbers<[1], [0], [0], [1], [0, 0, 1, 1], [], []>} : vector<16x16xf32>, vector<16x1024xf32>, vector<16x1024xf32> -> vector<16x1024xf32>
    %45 = arith.addf %41, %44 : vector<16x1024xf32>
    %c2 = arith.constant 2 : index
    %c0_20 = arith.constant 0 : index
    %c0_21 = arith.constant 0 : index
    %46 = vector.load %arg7[%c2, %c0_20, %c0_21] : memref<3x16x16xf32, #tpu.memory_space<vmem>>, vector<1x16x16xf32>
    %47 = vector.shape_cast %46 : vector<1x16x16xf32> to vector<16x16xf32>
    %cst_22 = arith.constant dense<0.000000e+00> : vector<16x1024xf32>
    %48 = tpu.matmul %47, %38, %cst_22 {dimension_numbers = #tpu.dot_dimension_numbers<[1], [0], [0], [1], [0, 0, 1, 1], [], []>} : vector<16x16xf32>, vector<16x1024xf32>, vector<16x1024xf32> -> vector<16x1024xf32>
    %49 = arith.addf %45, %48 : vector<16x1024xf32>
    %c0_23 = arith.constant 0 : index
    %c0_24 = arith.constant 0 : index
    %50 = vector.load %arg8[%c0_23, %c0_24] : memref<16x1xf32, #tpu.memory_space<vmem>>, vector<16x1xf32>
    %51 = vector.broadcast %50 : vector<16x1xf32> to vector<16x1024xf32>
    %52 = arith.addf %49, %51 : vector<16x1024xf32>
    %cst_25 = arith.constant 0.000000e+00 : f32
    %53 = vector.broadcast %cst_25 : f32 to vector<16x1024xf32>
    %54 = arith.cmpf ogt, %52, %53 : vector<16x1024xf32>
    %cst_26 = arith.constant 2.000000e-01 : f32
    %55 = vector.broadcast %cst_26 : f32 to vector<16x1024xf32>
    %56 = arith.mulf %55, %52 : vector<16x1024xf32>
    %57 = arith.select %54, %52, %56 : vector<16x1024xi1>, vector<16x1024xf32>
    %c0_27 = arith.constant 0 : index
    %c0_28 = arith.constant 0 : index
    %58 = vector.load %arg9[%c0_27, %c0_28] : memref<8x16xf32, #tpu.memory_space<vmem>>, vector<8x16xf32>
    %cst_29 = arith.constant dense<0.000000e+00> : vector<8x1024xf32>
    %59 = tpu.matmul %58, %57, %cst_29 {dimension_numbers = #tpu.dot_dimension_numbers<[1], [0], [0], [1], [0, 0, 1, 1], [], []>} : vector<8x16xf32>, vector<16x1024xf32>, vector<8x1024xf32> -> vector<8x1024xf32>
    %60 = vector.extract_strided_slice %59 {offsets = [0, 0], sizes = [1, 1024], strides = [1, 1]} : vector<8x1024xf32> to vector<1x1024xf32>
    %c1_i32_30 = arith.constant 1 : i32
    %61 = tpu.dynamic_rotate %60 by %c1_i32_30 dim 1 : vector<1x1024xf32>, i32 -> vector<1x1024xf32>
    %62 = arith.mulf %61, %1 : vector<1x1024xf32>
    %63 = vector.extract_strided_slice %59 {offsets = [1, 0], sizes = [1, 1024], strides = [1, 1]} : vector<8x1024xf32> to vector<1x1024xf32>
    %64 = arith.addf %62, %63 : vector<1x1024xf32>
    %65 = vector.extract_strided_slice %59 {offsets = [2, 0], sizes = [1, 1024], strides = [1, 1]} : vector<8x1024xf32> to vector<1x1024xf32>
    %c1023_i32_31 = arith.constant 1023 : i32
    %66 = tpu.dynamic_rotate %65 by %c1023_i32_31 dim 1 : vector<1x1024xf32>, i32 -> vector<1x1024xf32>
    %67 = arith.mulf %66, %2 : vector<1x1024xf32>
    %68 = arith.addf %64, %67 : vector<1x1024xf32>
    %c0_32 = arith.constant 0 : index
    %69 = memref.load %arg10[%c0_32] : memref<1xf32, #tpu.memory_space<smem>>
    %70 = vector.broadcast %69 : f32 to vector<1x1024xf32>
    %71 = arith.addf %68, %70 : vector<1x1024xf32>
    %c0_33 = arith.constant 0 : index
    %c0_34 = arith.constant 0 : index
    %72 = vector.load %arg2[%c0_33, %c0_34] : memref<1x1024xf32, #tpu.memory_space<vmem>>, vector<1x1024xf32>
    %73 = arith.addf %71, %72 : vector<1x1024xf32>
    %c0_35 = arith.constant 0 : index
    %c0_36 = arith.constant 0 : index
    %74 = vector.load %arg11[%c0_35, %c0_36] : memref<1x1024xf32, #tpu.memory_space<vmem>>, vector<1x1024xf32>
    tpu.vector_store %arg11[%c0_35, %c0_36], %73 {strides = array<i32>} : memref<1x1024xf32, #tpu.memory_space<vmem>>, vector<1x1024xf32>,
    return
  }
  func.func @transform_0(%arg0: i32) -> (i32, i32) {
    %c0_i32 = arith.constant 0 : i32
    %c0_i32_0 = arith.constant 0 : i32
    return %c0_i32, %arg0 : i32, i32
  }
  func.func @transform_1(%arg0: i32) -> (i32, i32) {
    %c0_i32 = arith.constant 0 : i32
    %c0_i32_0 = arith.constant 0 : i32
    return %c0_i32, %arg0 : i32, i32
  }
  func.func @transform_2(%arg0: i32) -> (i32, i32) {
    %c0_i32 = arith.constant 0 : i32
    %c0_i32_0 = arith.constant 0 : i32
    %c0_i32_1 = arith.constant 0 : i32
    return %c0_i32, %c0_i32_0 : i32, i32
  }
  func.func @transform_3(%arg0: i32) -> (i32, i32) {
    %c0_i32 = arith.constant 0 : i32
    %c0_i32_0 = arith.constant 0 : i32
    %c0_i32_1 = arith.constant 0 : i32
    return %c0_i32, %c0_i32_0 : i32, i32
  }
  func.func @transform_4(%arg0: i32) -> (i32, i32, i32) {
    %c0_i32 = arith.constant 0 : i32
    %c0_i32_0 = arith.constant 0 : i32
    %c0_i32_1 = arith.constant 0 : i32
    %c0_i32_2 = arith.constant 0 : i32
    return %c0_i32, %c0_i32_0, %c0_i32_1 : i32, i32, i32
  }
  func.func @transform_5(%arg0: i32) -> (i32, i32) {
    %c0_i32 = arith.constant 0 : i32
    %c0_i32_0 = arith.constant 0 : i32
    %c0_i32_1 = arith.constant 0 : i32
    return %c0_i32, %c0_i32_0 : i32, i32
  }
  func.func @transform_6(%arg0: i32) -> (i32, i32, i32) {
    %c0_i32 = arith.constant 0 : i32
    %c0_i32_0 = arith.constant 0 : i32
    %c0_i32_1 = arith.constant 0 : i32
    %c0_i32_2 = arith.constant 0 : i32
    return %c0_i32, %c0_i32_0, %c0_i32_1 : i32, i32, i32
  }
  func.func @transform_7(%arg0: i32) -> (i32, i32) {
    %c0_i32 = arith.constant 0 : i32
    %c0_i32_0 = arith.constant 0 : i32
    %c0_i32_1 = arith.constant 0 : i32
    return %c0_i32, %c0_i32_0 : i32, i32
  }
  func.func @transform_8(%arg0: i32) -> (i32, i32) {
    %c0_i32 = arith.constant 0 : i32
    %c0_i32_0 = arith.constant 0 : i32
    %c0_i32_1 = arith.constant 0 : i32
    return %c0_i32, %c0_i32_0 : i32, i32
  }
  func.func @transform_9(%arg0: i32) -> i32 {
    %c0_i32 = arith.constant 0 : i32
    %c0_i32_0 = arith.constant 0 : i32
    return %c0_i32 : i32
  }
  func.func @transform_10(%arg0: i32) -> (i32, i32) {
    %c0_i32 = arith.constant 0 : i32
    %c0_i32_0 = arith.constant 0 : i32
    return %c0_i32, %arg0 : i32, i32
  }
}

</mosaic_0001>

<bundles_post_ra>
// kernel: tpu_custom_call.1
= control target key start
LH: loop header
LB: loop body
LE: loop exit
PB: predicated region body
PF: predicated region fallthrough
CT: control target
= control target key end

     0   :  { %s3838_s0 = inlined_call_operand.vmem [shape: f32[1,2048], index: 0, kind: input, shape index: {}]   ;;  %s3839_s1 = inlined_call_operand.vmem [shape: f32[1,2048], index: 1, kind: input, shape index: {}]   ;;  %s3840_s2 = inlined_call_operand.vmem [shape: f32[1,1024], index: 2, kind: input, shape index: {}]   ;;  %s3841_s3 = inlined_call_operand.vmem [shape: f32[1,1024], index: 3, kind: input, shape index: {}]   ;;  %s3842_s4 = inlined_call_operand.vmem [shape: f32[3,16,1], index: 4, kind: input, shape index: {}]   ;;  %s3843_s5 = inlined_call_operand.vmem [shape: f32[16,1], index: 5, kind: input, shape index: {}]   ;;  %s3844_s6 = inlined_call_operand.vmem [shape: f32[3,16,16], index: 6, kind: input, shape index: {}]   ;;  %s3845_s7 = inlined_call_operand.vmem [shape: f32[16,1], index: 7, kind: input, shape index: {}]   ;;  %s3846_s8 = inlined_call_operand.hbm [shape: f32[8,16], index: 8, kind: input, shape index: {}]   ;;  %s3847_s9 = inlined_call_operand.<no memory space> [shape: f32[1], index: 9, kind: input, shape index: {}]   ;;  %s3848_s10 = inlined_call_operand.hbm [shape: f32[1,2048], index: 10, kind: output, shape index: {}]  }
   0x1   :  { %15 = sst [smem:[#allocation2]] %s3847_s9 }
   0x2   :  { %16 = vsyncpa [#allocation4], 0 }
   0x3   :  { %17 = vsyncpa [#allocation5], 0 }
   0x4   :  { %19 = vsyncpa [#allocation5 + $0x1], 0  ;;  %s2892_s15 = smov 0   ;;  %s2894_s16 = smov 0  }
   0x5   :  { %s2896_s17 = smov 0   ;;  %s2898_s18 = smov 0  }
   0x6 LB: > { %s2913_s9 = sadd.s32 4294967295, %s2825_s18   ;;  %s2631_s19 = sadd.s32 4294967294, %s2825_s18   ;;  %s2825_s18 = sphi %s2898_s18, %s3917_s18   ;;  %s2821_s17 = sphi %s2896_s17, %s3916_s17   ;;  %s2817_s16 = sphi %s2894_s16, %s3915_s16   ;;  %s2813_s15 = sphi %s2892_s15, %s3914_s15  }
   0x7   : > { %s2917_s20 = sadd.s32 1, %s2825_s18   ;;  %s252_s21 = sadd.s32 1, %s2821_s17 }
   0x8   : > { %s249_s22 = ssub.s32 %s2825_s18, %s2917_s20  ;;  %p262_p0 = scmp.ne.s32.totalorder %s2821_s17, %s2817_s16 }
   0x9   : > { %p250_p1 = scmp.eq.s32.totalorder %s249_s22, 0  ;;  %p263_p2 = scmp.eq.s32.totalorder %s2913_s9, 1 }
   0xa   : > { %p268_p3 = scmp.ne.s32.totalorder %s2817_s16, %s2813_s15  ;;  %p269_p4 = scmp.eq.s32.totalorder %s2631_s19, 1 }
   0xb   : > { %s2928_s23 = scalar_select %p250_p1, %s2821_s17, %s252_s21  }
   0xc   : > { %p2930_p5 = por %p263_p2, %p262_p0  ;;  %p2934_p6 = por %p269_p4, %p268_p3 }
   0xd   : > { %p2632_p7 = scmp.ge.s32.totalorder %s2825_s18, 1  ;;  %p276_p8 = scmp.lt.s32.totalorder %s2825_s18, 3 }
   0xe   : > { %s3875_s25 = scalar_select %p2934_p6, 1, 0 }
   0xf   : > { %p2692_p9 = scmp.eq.s32.totalorder %s2913_s9, 0  ;;  %p2941_p10 = pnand %p2632_p7, %p276_p8 }
  0x10   : > { %s2827_s27 = smov [#allocation3]  }
  0x11   : > { %s307_s28 = sshll.u32 %s2827_s27, 4  ;;  %p2684_p11 = pneg %p2941_p10  ;;  %s308_s28 = int_to_ptr.vmem [resolvable:$true] %s307_s28 }
  0x12   : > { %s2746_s29 = scalar_lea.vmem %s308_s28, 128  ;;  %p2754_p3 = scmp.lt.s32.totalorder %s308_s28, %s308_s28 }
  0x13   : > { %p2685_p12 = pnand %p2692_p9, %p2684_p11  ;;  %p2747_p0 = scmp.ne.s32.totalorder %s308_s28, %s2746_s29 }
  0x14   : > { %p2755_p4 = scmp.lt.s32.totalorder %s2746_s29, %s2746_s29 }
  0x15   : > { %p2737_p13 = pneg %p2685_p12 }
  0x16   : > { %p2756_p6 = por %p2755_p4, %p2754_p3 }
  0x17   : > { %p2749_p1 = pnand %p2747_p0, %p2737_p13 }
  0x19   : > { %p2750_p2 = pneg %p2749_p1 }
  0x1b   : > { %p2757_p7 = pnand %p2756_p6, %p2750_p2 }
  0x1d   : > { %2760 = shalt.err (!%p2757_p7)
}
  0x1e   : > { %2687 = dma.hbm_to_vmem [thread:$0]  (!%p2685_p12), %s3846_s8, 128, %s308_s28, [#allocation4]  }
  0x1f   : > { %339 = sbr.rel (%p2941_p10) target bundleno = 965 (0x3c5), region = 60 }
  0x24   : > { %2804 = dma.done.wait (%p2692_p9), [#allocation4], 128  }
  0x25   : > { %2806 = vsyncadd (%p2692_p9), [#allocation4], 4294967168  ;;  %s2638_s12 = sshll.u32 %s2913_s9, 3  ;;  %v395_v0 = vlaneseq  ;;  %v2828_v1 = vmov 0   ;;  %v586_v6 = vld [vmem:[%s3842_s4 + $0x8] sm:$0xff]  ;;  %s2829_s26 = smov 1  }
  0x26   : > { %2733 = vset.pattern.permute.xlu1 %v2828_v1  ;;  %p381_p6 = scmp.lt.s32.totalorder %s2638_s12, 15  ;;  %2734 = vset.pattern.permute.xlu0 %v2828_v1  ;;  %v588_v17 = vld [vmem:[%s3842_s4 + $0x18] sm:$0xff]  ;;  %s2830_s29 = smov 127   ;;  %v585_v20 = vld [vmem:[%s3842_s4] sm:$0xff]  ;;  %v587_v21 = vld [vmem:[%s3842_s4 + $0x10] sm:$0xff]  ;;  %v3849_v28 = vmov 0.0  }
  0x27   : > { %v2960_v2 = vshrl.u32 %v395_v0, 7  ;;  %598 = vperm.xlu1 %2733, %v586_v6   ;;  %v590_v22 = vld [vmem:[%s3842_s4 + $0x28] sm:$0xff]  ;;  %v589_v23 = vld [vmem:[%s3842_s4 + $0x20] sm:$0xff]  ;;  %1122 = vmatprep.mubr.f32.mxu1 %v3849_v28  ;;  %v3077_v31 = vand.u32 127, %v395_v0  ;;  %vm974_vm7 = vcmask 130048   ;;  %s2420_s27 = sld [smem:[#allocation2]] }
  0x28   : > { %s3919_s12 = smov (!%p381_p6, %s2638_s12), 15  ;;  %v766_v25 = vld [vmem:[%s3843_s5 + $0x8] sm:$0xff]  ;;  %v765_v27 = vld [vmem:[%s3843_s5] sm:$0xff]  ;;  %1045 = vmatprep.mubr.f32.mxu0 %v3849_v28  ;;  %s2677_s28 = sshll.u32 %s2913_s9, 7 }
  0x29   : > { %3877 = vst [vmem:[#allocation9_spill] sm:$0xff] %v2960_v2  ;;  %v2965_v3 = vsub.s32 0, %v2960_v2  ;;  %v2968_v4 = vsub.s32 2, %v2960_v2  ;;  %s383_s19 = scalar_lea.vmem %s3838_s0, %s3919_s12  ;;  %v2975_v5 = vsub.s32 1, %v2960_v2  ;;  %v2987_v10 = vsub.s32 3, %v2960_v2  ;;  %v392_v34 = vld [vmem:[%s3840_s2] sm:$0xff]  ;;  %s388_s22 = scalar_lea.vmem %s3839_s1, %s3919_s12 }
  0x2a   : > { %v391_v7 = vld [vmem:[%s383_s19] sm:$0xff]  ;;  %v2995_v12 = vsub.s32 7, %v2960_v2  ;;  %v3003_v14 = vsub.s32 6, %v2960_v2  ;;  %v3025_v18 = vsub.s32 4, %v2960_v2  ;;  %v3053_v24 = vsub.s32 5, %v2960_v2  ;;  %s377_s12 = sand.u32 1, %s2817_s16   ;;  %s2552_s19 = scalar_lea.hbm %s3848_s10, %s2677_s28 }
  0x2b   : > { %3878 = vst [vmem:[#allocation10_spill] sm:$0xff] %v2968_v4  ;;  %3879 = vst [vmem:[#allocation11_spill] sm:$0xff] %v2975_v5  ;;  %v2981_v8 = vrot.slane %v391_v7, %v2965_v3  ;;  %v2984_v9 = vrot.slane %v391_v7, %v2968_v4  ;;  %v2992_v11 = vrot.slane %v391_v7, %v2975_v5  ;;  %vm453_vm0 = vcmp.lt.s32.totalorder %v3077_v31, 1  ;;  %v393_v51 = vld [vmem:[%s3841_s3] sm:$0xff]  ;;  %s2833_s9 = smov [#allocation6]  }
  0x2c   : > { %3880 = vst [vmem:[#allocation12_spill] sm:$0xff] %v2987_v10  ;;  %3881 = vst [vmem:[#allocation13_spill] sm:$0xff] %v2995_v12  ;;  %v3000_v13 = vrot.slane %v391_v7, %v2987_v10  ;;  %v3008_v15 = vrot.slane %v391_v7, %v2995_v12  ;;  %v3013_v16 = vrot.slane %v391_v7, %v3003_v14  ;;  %vm527_vm1 = vcmp.lt.s32.totalorder %v3077_v31, 127 }
  0x2d   : > { %435 = vrot.lane.b32.xlu0 %v2981_v8, %s2829_s26  ;;  %439 = vrot.lane.b32.xlu1 %v2984_v9, %s2829_s26  ;;  %3882 = vst [vmem:[#allocation14_spill] sm:$0xff] %v3003_v14  ;;  %3883 = vst [vmem:[#allocation15_spill] sm:$0xff] %v3025_v18  ;;  %v3032_v19 = vrot.slane %v391_v7, %v3025_v18  ;;  %v3059_v26 = vrot.slane %v391_v7, %v3053_v24 }
  0x2e   : > { %3884 = vst [vmem:[#allocation16_spill] sm:$0xff] %v3053_v24  ;;  %v3086_v36 = vrot.slane %v392_v34, %v2975_v5  ;;  %v3091_v39 = vrot.slane %v392_v34, %v2987_v10  ;;  %v3097_v41 = vrot.slane %v392_v34, %v2995_v12  ;;  %v3100_v42 = vrot.slane %v392_v34, %v2965_v3 }
  0x2f   : > { %v3103_v43 = vrot.slane %v392_v34, %v2968_v4  ;;  %v3127_v57 = vrot.slane %v393_v51, %v2965_v3  ;;  %v3130_v58 = vrot.slane %v393_v51, %v2975_v5  ;;  %v3134_v61 = vrot.slane %v393_v51, %v2968_v4 }
  0x30   : > { %3885 = vst [vmem:[#allocation17_spill] sm:$0xff] %v3097_v41  ;;  %v3137_v62 = vrot.slane %v393_v51, %v2987_v10  ;;  %v3140_v63 = vrot.slane %v393_v51, %v2995_v12  ;;  %v3144_v1 = vrot.slane %v392_v34, %v3025_v18  ;;  %v3147_v6 = vrot.slane %v392_v34, %v3053_v24 }
  0x31   : > { %437 = vrot.lane.b32.xlu0 %v2992_v11, %s2829_s26  ;;  %441 = vrot.lane.b32.xlu1 %v3000_v13, %s2829_s26  ;;  %3886 = vst [vmem:[#allocation18_spill] sm:$0xff] %v3127_v57  ;;  %3887 = vst [vmem:[#allocation19_spill] sm:$0xff] %v3130_v58  ;;  %v3150_v7 = vrot.slane %v392_v34, %v3003_v14 }
  0x32   : > { %3888 = vst [vmem:[#allocation20_spill] sm:$0xff] %v3134_v61  ;;  %3889 = vst [vmem:[#allocation21_spill] sm:$0xff] %v3137_v62 }
  0x33   : > { %3890 = vst [vmem:[#allocation22_spill] sm:$0xff] %v3140_v63  ;;  %3891 = vst [vmem:[#allocation23_spill] sm:$0xff] %v3150_v7 }
  0x35   : > { %449 = vrot.lane.b32.xlu0 %v3008_v15, %s2829_s26  ;;  %447 = vrot.lane.b32.xlu1 %v3013_v16, %s2829_s26 }
  0x39   : > { %656 = vperm.xlu0 %2734, %v588_v17   ;;  %511 = vrot.lane.b32.xlu1 %v2981_v8, %s2830_s29 }
  0x3d   : > { %513 = vrot.lane.b32.xlu0 %v2992_v11, %s2830_s29  ;;  %515 = vrot.lane.b32.xlu1 %v2984_v9, %s2830_s29 }
  0x41   : > { %517 = vrot.lane.b32.xlu0 %v3000_v13, %s2830_s29  ;;  %519 = vrot.lane.b32.xlu1 %v3032_v19, %s2830_s29 }
  0x45   : > { %593 = vperm.xlu0 %2734, %v585_v20   ;;  %651 = vperm.xlu1 %2733, %v587_v21  }
  0x49   : > { %698 = vperm.xlu0 %2734, %v590_v22   ;;  %525 = vrot.lane.b32.xlu1 %v3008_v15, %s2830_s29 }
  0x4d   : > { %693 = vperm.xlu0 %2734, %v589_v23   ;;  %774 = vperm.xlu1 %2733, %v766_v25   ;;  %v3158_v23 = vrot.slane %v393_v51, %v3025_v18 }
  0x51   : > { %443 = vrot.lane.b32.xlu0 %v3032_v19, %s2829_s26  ;;  %445 = vrot.lane.b32.xlu1 %v3059_v26, %s2829_s26 }
  0x55   : > { %769 = vperm.xlu0 %2734, %v765_v27   ;;  %521 = vrot.lane.b32.xlu1 %v3059_v26, %s2830_s29 }
  0x59   : > { %523 = vrot.lane.b32.xlu0 %v3013_v16, %s2830_s29 }
  0x9f   : > { %v436_v29 = vpop.permute.xlu0 %435 }
  0xa2   : > { %v3074_v30 = vpop.permute.xlu1 %598 }
  0xa3   : > { %v438_v32 = vpop.permute.xlu0 %437 }
  0xa4   : > { %v460_v37 = vsel %vm453_vm0, %v436_v29, %v438_v32 }
  0xa5   : > { %v504_v45 = vmul.f32 %v3086_v36, %v460_v37 }
  0xa6   : > { %v440_v33 = vpop.permute.xlu1 %439 }
  0xa7   : > { %v450_v38 = vpop.permute.xlu0 %449  ;;  %v459_v47 = vsel %vm453_vm0, %v438_v32, %v440_v33  ;;  %v608_v56 = vrot.slane %v504_v45, %v2965_v3  ;;  %v3167_v32 = vrot.slane %v393_v51, %v3003_v14 }
  0xa8   : > { %v461_v46 = vsel %vm453_vm0, %v450_v38, %v436_v29  ;;  %v505_v54 = vmul.f32 %v3103_v43, %v459_v47  ;;  %v3164_v29 = vrot.slane %v393_v51, %v3053_v24 }
  0xa9   : > { %v503_v53 = vmul.f32 %v3100_v42, %v461_v46  ;;  %v642_v27 = vmul.f32 %v608_v56, %v3074_v30  ;;  %3893 = vst [vmem:[#allocation25_spill] sm:$0xff] %v3167_v32 }
  0xaa   : > { %v3083_v35 = vpop.permute.xlu1 %441  ;;  %v612_v20 = vrot.slane %v505_v54, %v2965_v3  ;;  %3892 = vst [vmem:[#allocation24_spill] sm:$0xff] %v3164_v29 }
  0xab   : > { %v458_v40 = vsel %vm453_vm0, %v440_v33, %v3083_v35  ;;  %v604_v17 = vrot.slane %v503_v53, %v2965_v3 }
  0xac   : > { %v506_v49 = vmul.f32 %v3091_v39, %v458_v40  ;;  %v643_v51 = vmul.f32 %v612_v20, %v3074_v30 }
  0xae   : > { %v3105_v44 = vpop.permute.xlu1 %447  ;;  %v616_v59 = vrot.slane %v506_v49, %v2965_v3  ;;  %v641_v49 = vmul.f32 %v604_v17, %v3074_v30 }
  0xaf   : > { %v454_v48 = vsel %vm453_vm0, %v3105_v44, %v450_v38 }
  0xb0   : > { %v510_v52 = vmul.f32 %v3097_v41, %v454_v48  ;;  %v644_v33 = vmul.f32 %v616_v59, %v3074_v30 }
  0xb2   : > { %v3122_v55 = vpop.permute.xlu1 %511  ;;  %v632_v0 = vrot.slane %v510_v52, %v2965_v3 }
  0xb4   : > { %v657_v50 = vpop.permute.xlu0 %656  ;;  %v648_v45 = vmul.f32 %v632_v0, %v3074_v30 }
  0xb5   : > { %v670_v37 = vmul.f32 %v657_v50, %v3000_v13  ;;  %v668_v38 = vmul.f32 %v657_v50, %v2992_v11  ;;  %v667_v40 = vmul.f32 %v657_v50, %v2981_v8  ;;  %v669_v48 = vmul.f32 %v657_v50, %v2984_v9 }
  0xb6   : > { %v516_v22 = vpop.permute.xlu1 %515  ;;  %v674_v28 = vmul.f32 %v657_v50, %v3008_v15 }
  0xb7   : > { %v684_v24 = vadd.f32 %v668_v38, %v642_v27  ;;  %v685_v10 = vadd.f32 %v669_v48, %v643_v51 }
  0xb8   : > { %v514_v60 = vpop.permute.xlu0 %513  ;;  %v3201_v2 = vadd.f32 %v674_v28, %v648_v45 }
  0xb9   : > { %v534_v21 = vsel %vm527_vm1, %v3122_v55, %v514_v60  ;;  %v533_v25 = vsel %vm527_vm1, %v514_v60, %v516_v22 }
  0xba   : > { %v577_v46 = vmul.f32 %v3127_v57, %v534_v21  ;;  %v578_v52 = vmul.f32 %v3130_v58, %v533_v25  ;;  %v3182_v54 = vpop.permute.xlu1 %519  ;;  %v3188_v21 = vmul.f32 %v657_v50, %v3032_v19  ;;  %v3198_v25 = vmul.f32 %v657_v50, %v3013_v16 }
  0xbc   : > { %v518_v34 = vpop.permute.xlu0 %517  ;;  %v704_v18 = vrot.slane %v577_v46, %v2965_v3  ;;  %v708_v4 = vrot.slane %v578_v52, %v2965_v3 }
  0xbd   : > { %v532_v47 = vsel %vm527_vm1, %v516_v22, %v518_v34  ;;  %v531_v60 = vsel %vm527_vm1, %v518_v34, %v3182_v54  ;;  %v3191_v22 = vmul.f32 %v657_v50, %v3059_v26  ;;  %v683_v34 = vadd.f32 %v667_v40, %v641_v49 }
  0xbe   : > { %v579_v53 = vmul.f32 %v3134_v61, %v532_v47  ;;  %v580_v12 = vmul.f32 %v3137_v62, %v531_v60  ;;  %v686_v47 = vadd.f32 %v670_v37, %v644_v33 }
  0xc0   : > { %v3195_v14 = vpop.permute.xlu0 %593  ;;  %v712_v5 = vrot.slane %v579_v53, %v2965_v3  ;;  %v716_v57 = vrot.slane %v580_v12, %v2965_v3  ;;  %v652_v60 = vpop.permute.xlu1 %651 }
  0xc1   : > { %v634_v62 = vmul.f32 %v608_v56, %v3195_v14  ;;  %v660_v50 = vmul.f32 %v652_v60, %v2992_v11  ;;  %v636_v33 = vmul.f32 %v616_v59, %v3195_v14  ;;  %v633_v27 = vmul.f32 %v604_v17, %v3195_v14 }
  0xc2   : > { %v635_v37 = vmul.f32 %v612_v20, %v3195_v14  ;;  %v3214_v28 = vmul.f32 %v652_v60, %v3032_v19  ;;  %v662_v40 = vmul.f32 %v652_v60, %v3000_v13  ;;  %v659_v12 = vmul.f32 %v652_v60, %v2981_v8 }
  0xc3   : > { %v640_v45 = vmul.f32 %v632_v0, %v3195_v14  ;;  %v3226_v46 = vmul.f32 %v652_v60, %v3059_v26  ;;  %v3229_v19 = vmul.f32 %v652_v60, %v3013_v16  ;;  %v661_v8 = vmul.f32 %v652_v60, %v2984_v9 }
  0xc4   : > { %v3211_v38 = vpop.permute.xlu0 %698  ;;  %v3223_v20 = vpop.permute.xlu1 %525  ;;  %v666_v13 = vmul.f32 %v652_v60, %v3008_v15  ;;  %v676_v48 = vadd.f32 %v660_v50, %v634_v62  ;;  %v678_v49 = vadd.f32 %v662_v40, %v636_v33  ;;  %v675_v51 = vadd.f32 %v659_v12, %v633_v27 }
  0xc5   : > { %v744_v56 = vmul.f32 %v716_v57, %v3211_v38  ;;  %v742_v11 = vmul.f32 %v708_v4, %v3211_v38  ;;  %v741_v59 = vmul.f32 %v704_v18, %v3211_v38  ;;  %v743_v17 = vmul.f32 %v712_v5, %v3211_v38 }
  0xc6   : > { %v535_v0 = vsel %vm527_vm1, %v3223_v20, %v3122_v55  ;;  %v3248_v62 = vadd.f32 %v661_v8, %v635_v37 }
  0xc7   : > { %v584_v52 = vmul.f32 %v3140_v63, %v535_v0  ;;  %v760_v26 = vadd.f32 %v744_v56, %v686_v47  ;;  %v758_v61 = vadd.f32 %v742_v11, %v684_v24  ;;  %v757_v16 = vadd.f32 %v741_v59, %v683_v34 }
  0xc8   : > { %v3238_v53 = vpop.permute.xlu0 %693  ;;  %v759_v58 = vadd.f32 %v743_v17, %v685_v10  ;;  %v3246_v55 = vpop.permute.xlu1 %774  ;;  %v3253_v47 = vadd.f32 %v666_v13, %v640_v45 }
  0xc9   : > { %v734_v9 = vmul.f32 %v708_v4, %v3238_v53  ;;  %v736_v15 = vmul.f32 %v716_v57, %v3238_v53  ;;  %v733_v60 = vmul.f32 %v704_v18, %v3238_v53  ;;  %v3244_v41 = vrot.slane %v584_v52, %v2965_v3 }
  0xca   : > { %v3251_v50 = vmul.f32 %v712_v5, %v3238_v53  ;;  %v788_v10 = vadd.f32 %v3246_v55, %v760_v26  ;;  %v786_v4 = vadd.f32 %v3246_v55, %v758_v61  ;;  %v785_v24 = vadd.f32 %v3246_v55, %v757_v16 }
  0xcb   : > { %v787_v18 = vadd.f32 %v3246_v55, %v759_v58  ;;  %v3261_v57 = vmul.f32 %v3244_v41, %v3211_v38  ;;  %v750_v33 = vadd.f32 %v734_v9, %v676_v48  ;;  %v752_v27 = vadd.f32 %v736_v15, %v678_v49 }
  0xcc   : > { %v444_v34 = vpop.permute.xlu0 %443  ;;  %v3263_v37 = vadd.f32 %v733_v60, %v675_v51  ;;  %vm804_vm2 = vcmp.gt.f32.partialorder %v788_v10, 0.0  ;;  %v820_v40 = vmul.f32 0.2, %v788_v10  ;;  %vm802_vm3 = vcmp.gt.f32.partialorder %v786_v4, 0.0  ;;  %v446_v12 = vpop.permute.xlu1 %445 }
  0xcd   : > { %v457_v5 = vsel %vm453_vm0, %v3083_v35, %v444_v34  ;;  %v818_v58 = vmul.f32 0.2, %v786_v4  ;;  %vm801_vm4 = vcmp.gt.f32.partialorder %v785_v24, 0.0  ;;  %v817_v45 = vmul.f32 0.2, %v785_v24 }
  0xce   : > { %v507_v61 = vmul.f32 %v3144_v1, %v457_v5  ;;  %v455_v56 = vsel %vm453_vm0, %v446_v12, %v3105_v44  ;;  %v456_v11 = vsel %vm453_vm0, %v444_v34, %v446_v12  ;;  %v3274_v59 = vsel %vm804_vm2, %v788_v10, %v820_v40 }
  0xcf   : > { %vm803_vm5 = vcmp.gt.f32.partialorder %v787_v18, 0.0  ;;  %v508_v17 = vmul.f32 %v3147_v6, %v456_v11  ;;  %v509_v8 = vmul.f32 %v3150_v7, %v455_v56  ;;  %1086 = vmatprep.subr.mxu1 %v3274_v59  ;;  %v3280_v13 = vsel %vm802_vm3, %v786_v4, %v818_v58 }
  0xd0   : > { %v620_v35 = vrot.slane %v507_v61, %v2965_v3  ;;  %v3282_v0 = vpop.permute.xlu0 %769  ;;  %847 = vrot.lane.b32.xlu0 %v3280_v13, %s2829_s26  ;;  %1009 = vmatprep.subr.mxu0 %v3280_v13  ;;  %v3287_v44 = vsel %vm801_vm4, %v785_v24, %v817_v45  ;;  %v819_v48 = vmul.f32 0.2, %v787_v18  ;;  %v522_v15 = vpop.permute.xlu1 %521 }
  0xd1   : > { %v778_v49 = vadd.f32 %v3282_v0, %v750_v33  ;;  %v780_v51 = vadd.f32 %v3282_v0, %v752_v27  ;;  %v624_v16 = vrot.slane %v508_v17, %v2965_v3  ;;  %v628_v9 = vrot.slane %v509_v8, %v2965_v3  ;;  %843 = vrot.lane.b32.xlu1 %v3287_v44, %s2829_s26 }
  0xd2   : > { %v637_v52 = vmul.f32 %v620_v35, %v3195_v14  ;;  %v645_v26 = vmul.f32 %v620_v35, %v3074_v30  ;;  %1010 = vmatpush1.msra.mxu0 %v3287_v44  ;;  %v3299_v60 = vsel %vm803_vm5, %v787_v18, %v819_v48  ;;  %v530_v10 = vsel %vm527_vm1, %v3182_v54, %v522_v15 }
  0xd3   : > { %vm794_vm6 = vcmp.gt.f32.partialorder %v778_v49, 0.0  ;;  %v810_v4 = vmul.f32 0.2, %v778_v49  ;;  %v638_v33 = vmul.f32 %v624_v16, %v3195_v14  ;;  %v639_v27 = vmul.f32 %v628_v9, %v3195_v14  ;;  %1087 = vmatpush1.msra.mxu1 %v3299_v60 }
  0xd4   : > { %v679_v24 = vadd.f32 %v3214_v28, %v637_v52  ;;  %v687_v34 = vadd.f32 %v3188_v21, %v645_v26  ;;  %v524_v5 = vpop.permute.xlu0 %523  ;;  %v646_v18 = vmul.f32 %v624_v16, %v3074_v30  ;;  %v647_v40 = vmul.f32 %v628_v9, %v3074_v30  ;;  %855 = vrot.lane.b32.xlu0 %v3274_v59, %s2829_s26 }
  0xd5   : > { %v581_v61 = vmul.f32 %v3158_v23, %v530_v10  ;;  %v528_v54 = vsel %vm527_vm1, %v524_v5, %v3223_v20  ;;  %v3318_v21 = vadd.f32 %v3226_v46, %v638_v33  ;;  %v681_v14 = vadd.f32 %v3229_v19, %v639_v27  ;;  %851 = vrot.lane.b32.xlu1 %v3299_v60, %s2829_s26 }
  0xd6   : > { %v529_v30 = vsel %vm527_vm1, %v522_v15, %v524_v5  ;;  %v583_v28 = vmul.f32 %v3167_v32, %v528_v54  ;;  %v688_v12 = vadd.f32 %v3191_v22, %v646_v18  ;;  %v689_v58 = vadd.f32 %v3198_v25, %v647_v40 }
  0xd7   : > { %v720_v20 = vrot.slane %v581_v61, %v2965_v3  ;;  %v582_v45 = vmul.f32 %v3164_v29, %v529_v30  ;;  %v3332_v19 = vsel %vm794_vm6, %v778_v49, %v810_v4  ;;  %vm796_vm8 = vcmp.gt.f32.partialorder %v780_v51, 0.0 }
  0xd8   : > { %v728_v46 = vrot.slane %v583_v28, %v2965_v3  ;;  %v812_v56 = vmul.f32 0.2, %v780_v51  ;;  %1011 = vmatprep.subr.mxu0 %v3332_v19  ;;  %v777_v22 = vadd.f32 %v3282_v0, %v3263_v37  ;;  %v751_v49 = vadd.f32 %v3251_v50, %v3248_v62  ;;  %v3357_v62 = vld [vmem:[%s3844_s6 + $0x10] sm:$0xff] }
  0xd9   : > { %v737_v11 = vmul.f32 %v720_v20, %v3238_v53  ;;  %v745_v35 = vmul.f32 %v720_v20, %v3211_v38  ;;  %v724_v17 = vrot.slane %v582_v45, %v2965_v3  ;;  %v740_v4 = vmul.f32 %v3244_v41, %v3238_v53  ;;  %v2641_v45 = vld [vmem:[%s3844_s6 + $0x18] sm:$0xff] }
  0xda   : > { %v739_v25 = vmul.f32 %v728_v46, %v3238_v53  ;;  %v747_v8 = vmul.f32 %v728_v46, %v3211_v38  ;;  %v3342_v48 = vsel %vm796_vm8, %v780_v51, %v812_v56  ;;  %vm793_vm9 = vcmp.gt.f32.partialorder %v777_v22, 0.0 }
  0xdb   : > { %v753_v52 = vadd.f32 %v737_v11, %v679_v24  ;;  %v738_v26 = vmul.f32 %v724_v17, %v3238_v53  ;;  %v746_v16 = vmul.f32 %v724_v17, %v3211_v38  ;;  %1088 = vmatprep.subr.mxu1 %v3342_v48  ;;  %v809_v37 = vmul.f32 0.2, %v777_v22 }
  0xdc   : > { %v755_v9 = vadd.f32 %v739_v25, %v681_v14  ;;  %v763_v15 = vadd.f32 %v747_v8, %v689_v58  ;;  %v779_v10 = vadd.f32 %v3282_v0, %v751_v49  ;;  %v764_v51 = vadd.f32 %v3261_v57, %v3201_v2 }
  0xdd   : > { %v762_v38 = vadd.f32 %v746_v16, %v688_v12  ;;  %v761_v50 = vadd.f32 %v745_v35, %v687_v34  ;;  %v3359_v24 = vsel %vm793_vm9, %v777_v22, %v809_v37  ;;  %v756_v41 = vadd.f32 %v740_v4, %v3253_v47 }
  0xde   : > { %vm795_vm10 = vcmp.gt.f32.partialorder %v779_v10, 0.0  ;;  %v811_v33 = vmul.f32 0.2, %v779_v10  ;;  %v791_v27 = vadd.f32 %v3246_v55, %v763_v15  ;;  %1012 = vmatpush1.msra.mxu0 %v3359_v24  ;;  %v792_v2 = vadd.f32 %v3246_v55, %v764_v51  ;;  %841 = vrot.lane.b32.xlu0 %v3359_v24, %s2829_s26 }
  0xdf   : > { %v790_v53 = vadd.f32 %v3246_v55, %v762_v38  ;;  %v789_v5 = vadd.f32 %v3246_v55, %v761_v50  ;;  %2642 = vmatmul.mubr.msk.f32.vlgmr.msra.gmra.mxu0 %vm974_vm7, %v3357_v62  ;;  %v784_v40 = vadd.f32 %v3282_v0, %v756_v41  ;;  %v3894_v61 = vmov 0.0   ;;  %v969_v41 = vld [vmem:[%s3844_s6] sm:$0xff] }
  0xe0   : > { %v3368_v57 = vsel %vm795_vm10, %v779_v10, %v811_v33  ;;  %vm807_vm11 = vcmp.gt.f32.partialorder %v791_v27, 0.0  ;;  %v823_v34 = vmul.f32 0.2, %v791_v27  ;;  %vm808_vm12 = vcmp.gt.f32.partialorder %v792_v2, 0.0  ;;  %1051 = vmatprep.mubr.f32.mxu0 %v3894_v61 }
  0xe1   : > { %1089 = vmatpush1.msra.mxu1 %v3368_v57  ;;  %v824_v18 = vmul.f32 0.2, %v792_v2  ;;  %vm806_vm13 = vcmp.gt.f32.partialorder %v790_v53, 0.0  ;;  %v822_v47 = vmul.f32 0.2, %v790_v53  ;;  %vm805_vm14 = vcmp.gt.f32.partialorder %v789_v5, 0.0 }
  0xe2   : > { %2644 = vmatmul.mubr.msk.f32.vlgmr.msra.gmra.mxu1 %vm974_vm7, %v3357_v62  ;;  %v3378_v54 = vsel %vm807_vm11, %v791_v27, %v823_v34  ;;  %v821_v55 = vmul.f32 0.2, %v789_v5  ;;  %849 = vrot.lane.b32.xlu0 %v3368_v57, %s2829_s26  ;;  %vm800_vm15 = vcmp.gt.f32.partialorder %v784_v40, 0.0  ;;  %v816_v30 = vmul.f32 0.2, %v784_v40 }
  0xe3   : > { %v3380_v14 = vsel %vm808_vm12, %v792_v2, %v824_v18  ;;  %v754_v28 = vadd.f32 %v738_v26, %v3318_v21  ;;  %1128 = vmatprep.mubr.f32.mxu1 %v3894_v61  ;;  %v838_v12 = vsel %vm806_vm13, %v790_v53, %v822_v47  ;;  %v783_v20 = vadd.f32 %v3282_v0, %v755_v9  ;;  %v970_v47 = vld [vmem:[%s3844_s6 + $0x8] sm:$0xff] }
  0xe4   : > { %871 = vrot.lane.b32.xlu1 %v3380_v14, %s2829_s26  ;;  %1240 = vmatprep.subr.mxu1 %v3380_v14  ;;  %v837_v58 = vsel %vm805_vm14, %v789_v5, %v821_v55  ;;  %v832_v46 = vsel %vm800_vm15, %v784_v40, %v816_v30  ;;  %v781_v56 = vadd.f32 %v3282_v0, %v753_v52 }
  0xe5   : > { %1163 = vmatprep.subr.mxu0 %v838_v12  ;;  %1241 = vmatpush1.msra.mxu1 %v3378_v54  ;;  %v782_v21 = vadd.f32 %v3282_v0, %v754_v28  ;;  %vm799_vm2 = vcmp.gt.f32.partialorder %v783_v20, 0.0  ;;  %v815_v11 = vmul.f32 0.2, %v783_v20 }
  0xe6   : > { %1164 = vmatpush1.msra.mxu0 %v837_v58  ;;  %1242 = vmatprep.subr.mxu1 %v832_v46  ;;  %vm797_vm4 = vcmp.gt.f32.partialorder %v781_v56, 0.0  ;;  %v813_v17 = vmul.f32 0.2, %v781_v56 }
  0xe7   : > { %869 = vrot.lane.b32.xlu0 %v832_v46, %s2829_s26  ;;  %vm798_vm3 = vcmp.gt.f32.partialorder %v782_v21, 0.0  ;;  %v814_v35 = vmul.f32 0.2, %v782_v21  ;;  %2645 = vmatmul.mubr.msk.f32.gmra.mxu1 %vm974_vm7, %v2641_v45  ;;  %v831_v22 = vsel %vm799_vm2, %v783_v20, %v815_v11 }
  0xe8   : > { %845 = vrot.lane.b32.xlu1 %v3332_v19, %s2829_s26  ;;  %2643 = vmatmul.mubr.msk.f32.gmra.mxu0 %vm974_vm7, %v2641_v45  ;;  %v829_v0 = vsel %vm797_vm4, %v781_v56, %v813_v17  ;;  %v3895_v56 = vld [vmem:[#allocation17_spill] sm:$0xff] }
  0xe9   : > { %v830_v25 = vsel %vm798_vm3, %v782_v21, %v814_v35  ;;  %1243 = vmatpush1.msra.mxu1 %v831_v22  ;;  %1276 = vmatprep.mubr.f32.mxu1 %v3894_v61 }
  0xea   : > { %1165 = vmatprep.subr.mxu0 %v830_v25  ;;  %1199 = vmatprep.mubr.f32.mxu0 %v3894_v61 }
  0xeb   : > { %863 = vrot.lane.b32.xlu0 %v838_v12, %s2829_s26  ;;  %1166 = vmatpush1.msra.mxu0 %v829_v0 }
  0xec   : > { %853 = vrot.lane.b32.xlu1 %v3342_v48, %s2829_s26  ;;  %2648 = vmatmul.mubr.msk.f32.vlgmr.msra.gmra.mxu1 %vm974_vm7, %v3357_v62 }
  0xed   : > { %2646 = vmatmul.mubr.msk.f32.vlgmr.msra.gmra.mxu0 %vm974_vm7, %v3357_v62  ;;  %1282 = vmatprep.mubr.f32.mxu1 %v3894_v61 }
  0xee   : > { %1205 = vmatprep.mubr.f32.mxu0 %v3894_v61 }
  0xef   : > { %857 = vrot.lane.b32.xlu0 %v829_v0, %s2829_s26 }
  0xf0   : > { %859 = vrot.lane.b32.xlu1 %v837_v58, %s2829_s26  ;;  %2649 = vmatmul.mubr.msk.f32.gmra.mxu1 %vm974_vm7, %v2641_v45 }
  0xf1   : > { %2647 = vmatmul.mubr.msk.f32.gmra.mxu0 %vm974_vm7, %v2641_v45  ;;  %1436 = vmatprep.mubr.f32.mxu1 %v3894_v61 }
  0xf2   : > { %1359 = vmatprep.mubr.f32.mxu0 %v3894_v61 }
  0xf3   : > { %865 = vrot.lane.b32.xlu0 %v831_v22, %s2829_s26 }
  0xf4   : > { %867 = vrot.lane.b32.xlu1 %v3378_v54, %s2829_s26 }
  0xf7   : > { %915 = vrot.lane.b32.xlu0 %v3299_v60, %s2830_s29 }
  0xf8   : > { %861 = vrot.lane.b32.xlu1 %v830_v25, %s2829_s26 }
  0xfb   : > { %923 = vrot.lane.b32.xlu0 %v837_v58, %s2830_s29 }
  0xfc   : > { %911 = vrot.lane.b32.xlu1 %v3280_v13, %s2830_s29  ;;  %v1937_v13 = vld [vmem:[%s3845_s7 + $0x8] sm:$0xff] }
  0xff   : > { %909 = vrot.lane.b32.xlu0 %v3332_v19, %s2830_s29 }
 0x100   : > { %919 = vrot.lane.b32.xlu1 %v3274_v59, %s2830_s29  ;;  %v1936_v59 = vld [vmem:[%s3845_s7] sm:$0xff] }
 0x103   : > { %917 = vrot.lane.b32.xlu0 %v3342_v48, %s2830_s29 }
 0x104   : > { %907 = vrot.lane.b32.xlu1 %v3287_v44, %s2830_s29 }
 0x107   : > { %905 = vrot.lane.b32.xlu0 %v3359_v24, %s2830_s29 }
 0x108   : > { %913 = vrot.lane.b32.xlu1 %v3368_v57, %s2830_s29 }
 0x10b   : > { %931 = vrot.lane.b32.xlu0 %v3378_v54, %s2830_s29 }
 0x10c   : > { %921 = vrot.lane.b32.xlu1 %v829_v0, %s2830_s29 }
 0x10f   : > { %925 = vrot.lane.b32.xlu0 %v830_v25, %s2830_s29 }
 0x110   : > { %927 = vrot.lane.b32.xlu1 %v838_v12, %s2830_s29 }
 0x113   : > { %933 = vrot.lane.b32.xlu0 %v832_v46, %s2830_s29 }
 0x114   : > { %935 = vrot.lane.b32.xlu1 %v3380_v14, %s2830_s29 }
 0x117   : > { %1940 = vperm.xlu0 %2734, %v1936_v59  }
 0x118   : > { %929 = vrot.lane.b32.xlu1 %v831_v22, %s2830_s29 }
 0x11c   : > { %1945 = vperm.xlu1 %2733, %v1937_v13  }
 0x142   : > { %v848_v44 = vpop.permute.xlu0 %847 }
 0x143   : > { %v844_v60 = vpop.permute.xlu1 %843 }
 0x144   : > { %v886_v19 = vsel %vm453_vm0, %v844_v60, %v848_v44 }
 0x145   : > { %v898_v8 = vmul.f32 %v886_v19, %v3086_v36 }
 0x146   : > { %v856_v48 = vpop.permute.xlu0 %855 }
 0x147   : > { %v852_v49 = vpop.permute.xlu1 %851  ;;  %1323 = vmatprep.subr.mxu0 %v898_v8 }
 0x148   : > { %v884_v52 = vsel %vm453_vm0, %v848_v44, %v852_v49  ;;  %v882_v26 = vsel %vm453_vm0, %v852_v49, %v856_v48  ;;  %v3896_v49 = vld [vmem:[#allocation19_spill] sm:$0xff] }
 0x149   : > { %v899_v16 = vmul.f32 %v884_v52, %v3103_v43  ;;  %v900_v9 = vmul.f32 %v882_v26, %v3091_v39 }
 0x14b   : > { %1400 = vmatprep.subr.mxu1 %v900_v9 }
 0x14c   : > { %1401 = vmatpush1.msra.mxu1 %v899_v16 }
 0x150   : > { %v842_v15 = vpop.permute.xlu0 %841 }
 0x154   : > { %v850_v37 = vpop.permute.xlu0 %849 }
 0x156   : > { %v872_v10 = vpop.permute.xlu1 %871 }
 0x157   : > { %v888_v51 = vsel %vm453_vm0, %v872_v10, %v844_v60 }
 0x158   : > { %v897_v4 = vmul.f32 %v888_v51, %v3100_v42  ;;  %v3898_v51 = vld [vmem:[#allocation21_spill] sm:$0xff] }
 0x159   : > { %v870_v62 = vpop.permute.xlu0 %869 }
 0x15a   : > { %v846_v38 = vpop.permute.xlu1 %845  ;;  %1324 = vmatpush1.msra.mxu0 %v897_v4  ;;  %v887_v50 = vsel %vm453_vm0, %v870_v62, %v842_v15 }
 0x15b   : > { %v885_v24 = vsel %vm453_vm0, %v842_v15, %v846_v38  ;;  %v889_v33 = vmul.f32 %v887_v50, %v3100_v42  ;;  %v883_v53 = vsel %vm453_vm0, %v846_v38, %v850_v37 }
 0x15c   : > { %v890_v27 = vmul.f32 %v885_v24, %v3086_v36  ;;  %v891_v18 = vmul.f32 %v883_v53, %v3103_v43  ;;  %v3899_v24 = vld [vmem:[#allocation18_spill] sm:$0xff] }
 0x15d   : > { %v864_v2 = vpop.permute.xlu0 %863 }
 0x15e   : > { %v854_v57 = vpop.permute.xlu1 %853  ;;  %1325 = vmatprep.subr.mxu0 %v890_v27 }
 0x15f   : > { %v881_v34 = vsel %vm453_vm0, %v850_v37, %v854_v57  ;;  %1326 = vmatpush1.msra.mxu0 %v889_v33  ;;  %v3897_v37 = vld [vmem:[#allocation20_spill] sm:$0xff] }
 0x160   : > { %v892_v5 = vmul.f32 %v881_v34, %v3091_v39  ;;  %2650 = vmatmul.mubr.msk.f32.vlgmr.msra.gmra.mxu0 %vm974_vm7, %v969_v41 }
 0x161   : > { %1365 = vmatprep.mubr.f32.mxu0 %v3894_v61  ;;  %v858_v40 = vpop.permute.xlu0 %857 }
 0x162   : > { %v860_v54 = vpop.permute.xlu1 %859  ;;  %1402 = vmatprep.subr.mxu1 %v892_v5  ;;  %v879_v22 = vsel %vm453_vm0, %v854_v57, %v858_v40 }
 0x163   : > { %v880_v55 = vsel %vm453_vm0, %v856_v48, %v860_v54  ;;  %v878_v14 = vsel %vm453_vm0, %v860_v54, %v864_v2  ;;  %1403 = vmatpush1.msra.mxu1 %v891_v18  ;;  %v893_v60 = vmul.f32 %v879_v22, %v3144_v1  ;;  %v2658_v18 = vld [vmem:[%s3844_s6 + $0x20] sm:$0xff] }
 0x164   : > { %v901_v30 = vmul.f32 %v880_v55, %v3144_v1  ;;  %v902_v28 = vmul.f32 %v878_v14, %v3147_v6  ;;  %2652 = vmatmul.mubr.msk.f32.vlgmr.msra.gmra.mxu1 %vm974_vm7, %v969_v41  ;;  %2651 = vmatmul.mubr.msk.f32.gmra.mxu0 %vm974_vm7, %v970_v47 }
 0x165   : > { %1442 = vmatprep.mubr.f32.mxu1 %v3894_v61  ;;  %v866_v12 = vpop.permute.xlu0 %865  ;;  %1513 = vmatprep.mubr.f32.mxu0 %v3894_v61 }
 0x166   : > { %v868_v58 = vpop.permute.xlu1 %867  ;;  %1477 = vmatprep.subr.mxu0 %v902_v28  ;;  %v873_v20 = vsel %vm453_vm0, %v866_v12, %v870_v62  ;;  %v2659_v28 = vld [vmem:[%s3844_s6 + $0x28] sm:$0xff] }
 0x167   : > { %v874_v45 = vsel %vm453_vm0, %v868_v58, %v872_v10  ;;  %v876_v46 = vsel %vm453_vm0, %v864_v2, %v868_v58  ;;  %1478 = vmatpush1.msra.mxu0 %v901_v30  ;;  %v896_v35 = vmul.f32 %v873_v20, %v3895_v56 }
 0x168   : > { %v903_v21 = vmul.f32 %v876_v46, %v3150_v7  ;;  %v904_v11 = vmul.f32 %v874_v45, %v3895_v56  ;;  %2653 = vmatmul.mubr.msk.f32.gmra.mxu1 %vm974_vm7, %v970_v47 }
 0x169   : > { %v916_v17 = vpop.permute.xlu0 %915  ;;  %1590 = vmatprep.mubr.f32.mxu1 %v3894_v61 }
 0x16a   : > { %v862_v25 = vpop.permute.xlu1 %861  ;;  %1554 = vmatprep.subr.mxu1 %v904_v11 }
 0x16b   : > { %v877_v0 = vsel %vm453_vm0, %v858_v40, %v862_v25  ;;  %v875_v59 = vsel %vm453_vm0, %v862_v25, %v866_v12  ;;  %1555 = vmatpush1.msra.mxu1 %v903_v21 }
 0x16c   : > { %v894_v13 = vmul.f32 %v877_v0, %v3147_v6  ;;  %v895_v44 = vmul.f32 %v875_v59, %v3150_v7  ;;  %1556 = vmatprep.subr.mxu1 %v896_v35 }
 0x16d   : > { %v924_v19 = vpop.permute.xlu0 %923 }
 0x16e   : > { %v912_v8 = vpop.permute.xlu1 %911  ;;  %1479 = vmatprep.subr.mxu0 %v894_v13  ;;  %1557 = vmatpush1.msra.mxu1 %v895_v44 }
 0x16f   : > { %v948_v48 = vsel %vm527_vm1, %v912_v8, %v916_v17  ;;  %1480 = vmatpush1.msra.mxu0 %v893_v60  ;;  %2656 = vmatmul.mubr.msk.f32.vlgmr.msra.gmra.mxu1 %vm974_vm7, %v969_v41 }
 0x170   : > { %v962_v52 = vmul.f32 %v948_v48, %v3896_v49  ;;  %2654 = vmatmul.mubr.msk.f32.vlgmr.msra.gmra.mxu0 %vm974_vm7, %v969_v41  ;;  %1596 = vmatprep.mubr.f32.mxu1 %v3894_v61 }
 0x171   : > { %1519 = vmatprep.mubr.f32.mxu0 %v3894_v61  ;;  %v910_v26 = vpop.permute.xlu0 %909 }
 0x172   : > { %v920_v16 = vpop.permute.xlu1 %919  ;;  %1640 = vmatprep.subr.mxu0 %v962_v52 }
 0x173   : > { %v946_v9 = vsel %vm527_vm1, %v916_v17, %v920_v16  ;;  %v944_v15 = vsel %vm527_vm1, %v920_v16, %v924_v19  ;;  %2657 = vmatmul.mubr.msk.f32.gmra.mxu1 %vm974_vm7, %v970_v47 }
 0x174   : > { %v963_v10 = vmul.f32 %v946_v9, %v3897_v37  ;;  %v964_v4 = vmul.f32 %v944_v15, %v3898_v51  ;;  %2655 = vmatmul.mubr.msk.f32.gmra.mxu0 %vm974_vm7, %v970_v47  ;;  %1753 = vmatprep.mubr.f32.mxu1 %v3894_v61 }
 0x175   : > { %v918_v62 = vpop.permute.xlu0 %917  ;;  %1676 = vmatprep.mubr.f32.mxu0 %v3894_v61 }
 0x176   : > { %v908_v38 = vpop.permute.xlu1 %907  ;;  %1717 = vmatprep.subr.mxu1 %v964_v4 }
 0x177   : > { %v950_v50 = vsel %vm527_vm1, %v908_v38, %v912_v8  ;;  %1718 = vmatpush1.msra.mxu1 %v963_v10 }
 0x178   : > { %v961_v33 = vmul.f32 %v950_v50, %v3899_v24 }
 0x179   : > { %v906_v27 = vpop.permute.xlu0 %905 }
 0x17a   : > { %v914_v2 = vpop.permute.xlu1 %913  ;;  %1641 = vmatpush1.msra.mxu0 %v961_v33  ;;  %v949_v41 = vsel %vm527_vm1, %v906_v27, %v910_v26 }
 0x17b   : > { %v947_v53 = vsel %vm527_vm1, %v910_v26, %v914_v2  ;;  %v953_v57 = vmul.f32 %v949_v41, %v3899_v24  ;;  %v945_v40 = vsel %vm527_vm1, %v914_v2, %v918_v62 }
 0x17c   : > { %v954_v34 = vmul.f32 %v947_v53, %v3896_v49  ;;  %v955_v14 = vmul.f32 %v945_v40, %v3897_v37 }
 0x17d   : > { %v932_v5 = vpop.permute.xlu0 %931 }
 0x17e   : > { %v922_v47 = vpop.permute.xlu1 %921  ;;  %1642 = vmatprep.subr.mxu0 %v954_v34 }
 0x17f   : > { %v943_v54 = vsel %vm527_vm1, %v918_v62, %v922_v47  ;;  %1643 = vmatpush1.msra.mxu0 %v953_v57 }
 0x180   : > { %v956_v55 = vmul.f32 %v943_v54, %v3898_v51  ;;  %2660 = vmatmul.mubr.msk.f32.vlgmr.msra.gmra.mxu0 %vm974_vm7, %v2658_v18 }
 0x181   : > { %1682 = vmatprep.mubr.f32.mxu0 %v3894_v61  ;;  %v926_v30 = vpop.permute.xlu0 %925 }
 0x182   : > { %v928_v12 = vpop.permute.xlu1 %927  ;;  %1719 = vmatprep.subr.mxu1 %v956_v55  ;;  %v941_v13 = vsel %vm527_vm1, %v922_v47, %v926_v30 }
 0x183   : > { %v942_v58 = vsel %vm527_vm1, %v924_v19, %v928_v12  ;;  %v940_v20 = vsel %vm527_vm1, %v928_v12, %v932_v5  ;;  %1720 = vmatpush1.msra.mxu1 %v955_v14  ;;  %v957_v52 = vmul.f32 %v941_v13, %v3158_v23 }
 0x184   : > { %v965_v45 = vmul.f32 %v942_v58, %v3158_v23  ;;  %v966_v46 = vmul.f32 %v940_v20, %v3164_v29  ;;  %2662 = vmatmul.mubr.msk.f32.vlgmr.msra.gmra.mxu1 %vm974_vm7, %v2658_v18  ;;  %2661 = vmatmul.mubr.msk.f32.gmra.mxu0 %vm974_vm7, %v2659_v28 }
 0x185   : > { %1759 = vmatprep.mubr.f32.mxu1 %v3894_v61  ;;  %v934_v21 = vpop.permute.xlu0 %933  ;;  %1830 = vmatprep.mubr.f32.mxu0 %v3894_v61 }
 0x186   : > { %v936_v11 = vpop.permute.xlu1 %935  ;;  %1794 = vmatprep.subr.mxu0 %v966_v46  ;;  %v951_v35 = vsel %vm527_vm1, %v934_v21, %v906_v27 }
 0x187   : > { %v938_v17 = vsel %vm527_vm1, %v932_v5, %v936_v11  ;;  %v952_v22 = vsel %vm527_vm1, %v936_v11, %v908_v38  ;;  %1795 = vmatpush1.msra.mxu0 %v965_v45  ;;  %v960_v59 = vmul.f32 %v951_v35, %v3140_v63 }
 0x188   : > { %v967_v25 = vmul.f32 %v938_v17, %v3167_v32  ;;  %v968_v0 = vmul.f32 %v952_v22, %v3140_v63  ;;  %2663 = vmatmul.mubr.msk.f32.gmra.mxu1 %vm974_vm7, %v2659_v28 }
 0x189   : > { %1907 = vmatprep.mubr.f32.mxu1 %v3894_v61 }
 0x18a   : > { %v930_v44 = vpop.permute.xlu1 %929  ;;  %1871 = vmatprep.subr.mxu1 %v968_v0 }
 0x18b   : > { %v939_v60 = vsel %vm527_vm1, %v926_v30, %v930_v44  ;;  %v937_v19 = vsel %vm527_vm1, %v930_v44, %v934_v21  ;;  %1872 = vmatpush1.msra.mxu1 %v967_v25 }
 0x18c   : > { %v958_v8 = vmul.f32 %v939_v60, %v3164_v29  ;;  %v959_v48 = vmul.f32 %v937_v19, %v3167_v32  ;;  %1873 = vmatprep.subr.mxu1 %v960_v59 }
 0x18e   : > { %1796 = vmatprep.subr.mxu0 %v958_v8  ;;  %1874 = vmatpush1.msra.mxu1 %v959_v48 }
 0x18f   : > { %1797 = vmatpush1.msra.mxu0 %v957_v52  ;;  %2666 = vmatmul.mubr.msk.f32.vlgmr.msra.gmra.mxu1 %vm974_vm7, %v2658_v18 }
 0x190   : > { %2664 = vmatmul.mubr.msk.f32.vlgmr.msra.gmra.mxu0 %vm974_vm7, %v2658_v18  ;;  %1913 = vmatprep.mubr.f32.mxu1 %v3894_v61 }
 0x191   : > { %1836 = vmatprep.mubr.f32.mxu0 %v3894_v61 }
 0x192   : > { %v3612_v7 = vpop.permute.xlu0 %1940 }
 0x193   : > { %2667 = vmatmul.mubr.msk.f32.gmra.mxu1 %vm974_vm7, %v2659_v28 }
 0x194   : > { %2665 = vmatmul.mubr.msk.f32.gmra.mxu0 %vm974_vm7, %v2659_v28  ;;  %2151 = vmatprep.mubr.f32.mxu1 %v3894_v61 }
 0x195   : > { %2080 = vmatprep.mubr.f32.mxu0 %v3894_v61 }
 0x197   : > { %v3610_v19 = vpop.permute.xlu1 %1945 }
 0x19f   : > { %v1047_v26 = vpop.f32.mrf.mxu0 }
 0x1a1   : > { %v1049_v16 = vpop.f32.mrf.mxu0 }
 0x1a2   : > { %v1124_v9 = vpop.f32.mrf.mxu1 }
 0x1a4   : > { %v1126_v10 = vpop.f32.mrf.mxu1 }
 0x1a7   : > { %v1130_v62 = vpop.f32.mrf.mxu1 }
 0x1a8   : > { %v1053_v15 = vpop.f32.mrf.mxu0 }
 0x1a9   : > { %v1132_v38 = vpop.f32.mrf.mxu1 }
 0x1aa   : > { %v1055_v4 = vpop.f32.mrf.mxu0 }
 0x1ac   : > { %v1278_v27 = vpop.f32.mrf.mxu1 }
 0x1ad   : > { %v1201_v50 = vpop.f32.mrf.mxu0 }
 0x1ae   : > { %v1280_v41 = vpop.f32.mrf.mxu1 }
 0x1af   : > { %v1203_v33 = vpop.f32.mrf.mxu0 }
 0x1b0   : > { %v3598_v57 = vpop.f32.mrf.mxu1 }
 0x1b1   : > { %v3594_v2 = vpop.f32.mrf.mxu0 }
 0x1b2   : > { %v3600_v34 = vpop.f32.mrf.mxu1 }
 0x1b3   : > { %v3596_v53 = vpop.f32.mrf.mxu0 }
 0x220   : > { %v1361_v5 = vpop.f32.mrf.mxu0 }
 0x221   : > { %v1362_v25 = vadd.f32 %v1361_v5, %v1047_v26 }
 0x222   : > { %v1363_v18 = vpop.f32.mrf.mxu0 }
 0x223   : > { %v1364_v35 = vadd.f32 %v1363_v18, %v1049_v16 }
 0x224   : > { %v1438_v40 = vpop.f32.mrf.mxu1  ;;  %v1367_v47 = vpop.f32.mrf.mxu0 }
 0x225   : > { %v1368_v0 = vadd.f32 %v1367_v47, %v1053_v15  ;;  %v1439_v59 = vadd.f32 %v1438_v40, %v1124_v9 }
 0x226   : > { %v1440_v54 = vpop.f32.mrf.mxu1  ;;  %v1369_v55 = vpop.f32.mrf.mxu0 }
 0x227   : > { %v1441_v8 = vadd.f32 %v1440_v54, %v1126_v10  ;;  %v1370_v48 = vadd.f32 %v1369_v55, %v1055_v4 }
 0x228   : > { %v1444_v14 = vpop.f32.mrf.mxu1 }
 0x229   : > { %v1445_v16 = vadd.f32 %v1444_v14, %v1130_v62 }
 0x22a   : > { %v1446_v28 = vpop.f32.mrf.mxu1 }
 0x22b   : > { %v1447_v9 = vadd.f32 %v1446_v28, %v1132_v38 }
 0x22f   : > { %v1592_v12 = vpop.f32.mrf.mxu1 }
 0x230   : > { %v1515_v30 = vpop.f32.mrf.mxu0 }
 0x231   : > { %v1594_v20 = vpop.f32.mrf.mxu1  ;;  %v1516_v47 = vadd.f32 %v1515_v30, %v1201_v50 }
 0x232   : > { %v1517_v58 = vpop.f32.mrf.mxu0  ;;  %v1595_v54 = vadd.f32 %v1594_v20, %v1280_v41 }
 0x233   : > { %v3604_v46 = vpop.f32.mrf.mxu1  ;;  %v1518_v38 = vadd.f32 %v1517_v58, %v1203_v33 }
 0x234   : > { %v3602_v45 = vpop.f32.mrf.mxu0 }
 0x235   : > { %v3608_v17 = vpop.f32.mrf.mxu1 }
 0x236   : > { %v3606_v21 = vpop.f32.mrf.mxu0 }
 0x240   : > { %v1678_v11 = vpop.f32.mrf.mxu0 }
 0x241   : > { %v1920_v52 = vadd.f32 %v1678_v11, %v1362_v25 }
 0x242   : > { %v1680_v22 = vpop.f32.mrf.mxu0 }
 0x243   : > { %v1921_v44 = vadd.f32 %v1680_v22, %v1364_v35  ;;  %v1593_v35 = vadd.f32 %v1592_v12, %v1278_v27  ;;  %v1948_v10 = vadd.f32 %v3612_v7, %v1920_v52 }
 0x244   : > { %v1755_v13 = vpop.f32.mrf.mxu1  ;;  %v1684_v60 = vpop.f32.mrf.mxu0 }
 0x245   : > { %v1928_v63 = vadd.f32 %v1684_v60, %v1368_v0  ;;  %v1922_v32 = vadd.f32 %v1755_v13, %v1439_v59  ;;  %v1949_v5 = vadd.f32 %v3612_v7, %v1921_v44  ;;  %v1980_v14 = vmul.f32 0.2, %v1948_v10  ;;  %v3622_v13 = vld [vmem:[#allocation3] sm:$0xff] }
 0x246   : > { %v1757_v29 = vpop.f32.mrf.mxu1  ;;  %v1686_v56 = vpop.f32.mrf.mxu0  ;;  %vm1964_vm9 = vcmp.gt.f32.partialorder %v1948_v10, 0.0  ;;  %v1522_v44 = vadd.f32 %v3602_v45, %v3594_v2  ;;  %v1599_v60 = vadd.f32 %v3604_v46, %v3598_v57 }
 0x247   : > { %v1923_v18 = vadd.f32 %v1757_v29, %v1441_v8  ;;  %v1956_v26 = vadd.f32 %v3610_v19, %v1928_v63  ;;  %v1929_v15 = vadd.f32 %v1686_v56, %v1370_v48  ;;  %v1950_v55 = vadd.f32 %v3612_v7, %v1922_v32 }
 0x248   : > { %v1761_v40 = vpop.f32.mrf.mxu1  ;;  %v1981_v27 = vmul.f32 0.2, %v1949_v5  ;;  %vm1965_vm8 = vcmp.gt.f32.partialorder %v1949_v5, 0.0  ;;  %v1996_v52 = vsel %vm1964_vm9, %v1948_v10, %v1980_v14 }
 0x249   : > { %v1930_v4 = vadd.f32 %v1761_v40, %v1445_v16  ;;  %v1988_v11 = vmul.f32 0.2, %v1956_v26  ;;  %v1957_v22 = vadd.f32 %v3610_v19, %v1929_v15  ;;  %v1951_v29 = vadd.f32 %v3612_v7, %v1923_v18 }
 0x24a   : > { %v1763_v62 = vpop.f32.mrf.mxu1  ;;  %vm1972_vm5 = vcmp.gt.f32.partialorder %v1956_v26, 0.0  ;;  %v1982_v32 = vmul.f32 0.2, %v1950_v55  ;;  %v1997_v58 = vsel %vm1965_vm8, %v1949_v5, %v1981_v27  ;;  %vm1966_vm13 = vcmp.gt.f32.partialorder %v1950_v55, 0.0 }
 0x24b   : > { %v1958_v63 = vadd.f32 %v3610_v19, %v1930_v4  ;;  %v1931_v56 = vadd.f32 %v1763_v62, %v1447_v9  ;;  %vm1973_vm6 = vcmp.gt.f32.partialorder %v1957_v22, 0.0  ;;  %v1989_v50 = vmul.f32 0.2, %v1957_v22 }
 0x24c   : > { %v2004_v12 = vsel %vm1972_vm5, %v1956_v26, %v1988_v11  ;;  %v1983_v0 = vmul.f32 0.2, %v1951_v29  ;;  %vm1967_vm12 = vcmp.gt.f32.partialorder %v1951_v29, 0.0  ;;  %v1601_v16 = vadd.f32 %v3608_v17, %v3600_v34 }
 0x24d   : > { %v1959_v30 = vadd.f32 %v3610_v19, %v1931_v56  ;;  %v1990_v41 = vmul.f32 0.2, %v1958_v63  ;;  %v2005_v28 = vsel %vm1973_vm6, %v1957_v22, %v1989_v50  ;;  %vm1974_vm11 = vcmp.gt.f32.partialorder %v1958_v63, 0.0 }
 0x24e   : > { %2044 = vmatprep.subr.mxu0 %v2005_v28  ;;  %v1999_v45 = vsel %vm1967_vm12, %v1951_v29, %v1983_v0  ;;  %v1998_v57 = vsel %vm1966_vm13, %v1950_v55, %v1982_v32  ;;  %v1524_v40 = vadd.f32 %v3606_v21, %v3596_v53 }
 0x24f   : > { %v1909_v20 = vpop.f32.mrf.mxu1  ;;  %vm1975_vm10 = vcmp.gt.f32.partialorder %v1959_v30, 0.0  ;;  %v1991_v25 = vmul.f32 0.2, %v1959_v30  ;;  %2045 = vmatpush1.msra.mxu0 %v2004_v12  ;;  %v2006_v15 = vsel %vm1974_vm11, %v1958_v63, %v1990_v41 }
 0x250   : > { %v1832_v59 = vpop.f32.mrf.mxu0  ;;  %v1926_v33 = vadd.f32 %v1909_v20, %v1593_v35  ;;  %2046 = vmatprep.subr.mxu0 %v1997_v58 }
 0x251   : > { %v1911_v8 = vpop.f32.mrf.mxu1  ;;  %v2007_v48 = vsel %vm1975_vm10, %v1959_v30, %v1991_v25  ;;  %2047 = vmatpush1.msra.mxu0 %v1996_v52  ;;  %v1924_v46 = vadd.f32 %v1832_v59, %v1516_v47 }
 0x252   : > { %v1834_v18 = vpop.f32.mrf.mxu0  ;;  %v1927_v26 = vadd.f32 %v1911_v8, %v1595_v54  ;;  %2115 = vmatprep.subr.mxu1 %v2007_v48  ;;  %2668 = vmatmul.mubr.msk.f32.vlgmr.msra.gmra.mxu0 %vm974_vm7, %v3622_v13  ;;  %v1954_v5 = vadd.f32 %v3612_v7, %v1926_v33 }
 0x253   : > { %v1925_v9 = vadd.f32 %v1834_v18, %v1518_v38  ;;  %2116 = vmatpush1.msra.mxu1 %v2006_v15  ;;  %v1915_v2 = vpop.f32.mrf.mxu1  ;;  %2222 = vmatprep.mubr.f32.mxu0 %v3894_v61  ;;  %v1952_v53 = vadd.f32 %v3612_v7, %v1924_v46 }
 0x254   : > { %v1838_v34 = vpop.f32.mrf.mxu0  ;;  %v1934_v17 = vadd.f32 %v1915_v2, %v1599_v60  ;;  %2117 = vmatprep.subr.mxu1 %v1999_v45  ;;  %v1955_v35 = vadd.f32 %v3612_v7, %v1927_v26  ;;  %v1986_v21 = vmul.f32 0.2, %v1954_v5  ;;  %vm1970_vm6 = vcmp.gt.f32.partialorder %v1954_v5, 0.0 }
 0x255   : > { %v1932_v10 = vadd.f32 %v1838_v34, %v1522_v44  ;;  %2118 = vmatpush1.msra.mxu1 %v1998_v57  ;;  %v1917_v4 = vpop.f32.mrf.mxu1  ;;  %v1953_v47 = vadd.f32 %v3612_v7, %v1925_v9  ;;  %v1984_v32 = vmul.f32 0.2, %v1952_v53  ;;  %vm1968_vm8 = vcmp.gt.f32.partialorder %v1952_v53, 0.0 }
 0x256   : > { %v1962_v54 = vadd.f32 %v3610_v19, %v1934_v17  ;;  %v1840_v11 = vpop.f32.mrf.mxu0  ;;  %v1935_v55 = vadd.f32 %v1917_v4, %v1601_v16  ;;  %2669 = vmatmul.mubr.msk.f32.vlgmr.msra.gmra.mxu1 %vm974_vm7, %v3622_v13  ;;  %vm1971_vm14 = vcmp.gt.f32.partialorder %v1955_v35, 0.0  ;;  %v1987_v38 = vmul.f32 0.2, %v1955_v35  ;;  %v3713_v4 = vld [vmem:[%s388_s22] sm:$0xff]  ;;  %s2765_s22 = sshll.u32 %s2833_s9, 4  ;;  %s2766_s22 = int_to_ptr.vmem [resolvable:$false] %s2765_s22 }
 0x257   : > { %v1960_v22 = vadd.f32 %v3610_v19, %v1932_v10  ;;  %v1933_v62 = vadd.f32 %v1840_v11, %v1524_v40  ;;  %2293 = vmatprep.mubr.f32.mxu1 %v3894_v61  ;;  %v1985_v30 = vmul.f32 0.2, %v1953_v47  ;;  %vm1969_vm5 = vcmp.gt.f32.partialorder %v1953_v47, 0.0 }
 0x258   : > { %v1963_v29 = vadd.f32 %v3610_v19, %v1935_v55  ;;  %v1994_v63 = vmul.f32 0.2, %v1962_v54  ;;  %vm1978_vm2 = vcmp.gt.f32.partialorder %v1962_v54, 0.0  ;;  %v2003_v28 = vsel %vm1971_vm14, %v1955_v35, %v1987_v38 }
 0x259   : > { %v1961_v56 = vadd.f32 %v3610_v19, %v1933_v62  ;;  %v1992_v50 = vmul.f32 0.2, %v1960_v22  ;;  %vm1976_vm4 = vcmp.gt.f32.partialorder %v1960_v22, 0.0  ;;  %v2001_v12 = vsel %vm1969_vm5, %v1953_v47, %v1985_v30 }
 0x25a   : > { %vm1979_vm15 = vcmp.gt.f32.partialorder %v1963_v29, 0.0  ;;  %v1995_v27 = vmul.f32 0.2, %v1963_v29  ;;  %v2010_v41 = vsel %vm1978_vm2, %v1962_v54, %v1994_v63  ;;  %v2002_v20 = vsel %vm1970_vm6, %v1954_v5, %v1986_v21  ;;  %v3900_v63 = vld [vmem:[#allocation11_spill] sm:$0xff] }
 0x25b   : > { %vm1977_vm3 = vcmp.gt.f32.partialorder %v1961_v56, 0.0  ;;  %v1993_v14 = vmul.f32 0.2, %v1961_v56  ;;  %v2008_v19 = vsel %vm1976_vm4, %v1960_v22, %v1992_v50  ;;  %v2000_v25 = vsel %vm1968_vm8, %v1952_v53, %v1984_v32 }
 0x25c   : > { %v2011_v61 = vsel %vm1979_vm15, %v1963_v29, %v1995_v27  ;;  %v2832_v11 = vmov 1966171168  }
 0x25d   : > { %v2009_v7 = vsel %vm1977_vm3, %v1961_v56, %v1993_v14  ;;  %2257 = vmatprep.subr.mxu1 %v2011_v61  ;;  %v2493_v55 = vunpack.c.l.s4 %v2832_v11  ;;  %v2439_v56 = vrot.slane %v3713_v4, %v3900_v63  ;;  %v3729_v61 = vstv %s2420_s27  ;;  %v3907_v63 = vld [vmem:[#allocation17_spill] sm:$0xff]  ;;  %s2767_s27 = scalar_lea.vmem %s2766_s22, 256 }
 0x25e   : > { %2186 = vmatprep.subr.mxu0 %v2009_v7  ;;  %2258 = vmatpush1.msra.mxu1 %v2010_v41 }
 0x25f   : > { %2187 = vmatpush1.msra.mxu0 %v2008_v19  ;;  %2259 = vmatprep.subr.mxu1 %v2003_v28  ;;  %v2494_v30 = vunpack.c.0.s8 %v2493_v55  ;;  %v3901_v19 = vld [vmem:[#allocation10_spill] sm:$0xff] }
 0x260   : > { %2188 = vmatprep.subr.mxu0 %v2001_v12  ;;  %2260 = vmatpush1.msra.mxu1 %v2002_v20  ;;  %v2443_v28 = vrot.slane %v3713_v4, %v3901_v19  ;;  %v2435_v20 = vrot.slane %v3713_v4, %v2965_v3 }
 0x261   : > { %2189 = vmatpush1.msra.mxu0 %v2000_v25  ;;  %2671 = vmatmul.mubr.msk.f32.vlgmr.msra.gmra.mxu1 %vm974_vm7, %v3622_v13 }
 0x262   : > { %2670 = vmatmul.mubr.msk.f32.vlgmr.msra.gmra.mxu0 %vm974_vm7, %v3622_v13 }
 0x312   : > { %v3655_v0 = vpop.f32.mrf.mxu0 }
 0x313   : > { %2300 = vrot.lane.b32.xlu1 %v3655_v0, %s2829_s26  ;;  %v2364_v44 = vrot.slane %v3655_v0, 2  ;;  %v2340_v53 = vrot.slane %v3655_v0, 1 }
 0x314   : > { %v3659_v59 = vpop.f32.mrf.mxu0 }
 0x315   : > { %2302 = vrot.lane.b32.xlu0 %v3659_v59, %s2829_s26  ;;  %v2365_v13 = vrot.slane %v3659_v59, 2  ;;  %v2341_v38 = vrot.slane %v3659_v59, 1 }
 0x316   : > { %v3663_v33 = vpop.f32.mrf.mxu1 }
 0x317   : > { %2304 = vrot.lane.b32.xlu1 %v3663_v33, %s2829_s26  ;;  %v2366_v60 = vrot.slane %v3663_v33, 2  ;;  %v2342_v50 = vrot.slane %v3663_v33, 1 }
 0x318   : > { %v3667_v58 = vpop.f32.mrf.mxu1 }
 0x319   : > { %2306 = vrot.lane.b32.xlu0 %v3667_v58, %s2829_s26  ;;  %v2367_v8 = vrot.slane %v3667_v58, 2  ;;  %v2343_v32 = vrot.slane %v3667_v58, 1 }
 0x31b   : > { %2380 = vrot.lane.b32.xlu1 %v2364_v44, %s2830_s29  ;;  %v3902_v44 = vld [vmem:[#allocation9_spill] sm:$0xff] }
 0x31d   : > { %2382 = vrot.lane.b32.xlu0 %v2365_v13, %s2830_s29  ;;  %v3749_v13 = vsub.s32 %v2494_v30, %v3902_v44  ;;  %v3909_v44 = vld [vmem:[#allocation25_spill] sm:$0xff] }
 0x31f   : > { %2384 = vrot.lane.b32.xlu1 %v2366_v60, %s2830_s29 }
 0x321   : > { %2386 = vrot.lane.b32.xlu0 %v2367_v8, %s2830_s29  ;;  %v3685_v16 = vpop.f32.mrf.mxu1 }
 0x322   : > { %v3679_v48 = vpop.f32.mrf.mxu0  ;;  %v2370_v9 = vrot.slane %v3685_v16, 2  ;;  %v2346_v41 = vrot.slane %v3685_v16, 1 }
 0x323   : > { %2308 = vrot.lane.b32.xlu1 %v3679_v48, %s2829_s26  ;;  %v3691_v18 = vpop.f32.mrf.mxu1  ;;  %v2368_v26 = vrot.slane %v3679_v48, 2  ;;  %v2344_v7 = vrot.slane %v3679_v48, 1 }
 0x324   : > { %v3683_v52 = vpop.f32.mrf.mxu0  ;;  %v2371_v2 = vrot.slane %v3691_v18, 2 }
 0x325   : > { %2310 = vrot.lane.b32.xlu0 %v3683_v52, %s2829_s26  ;;  %v2369_v15 = vrot.slane %v3683_v52, 2  ;;  %v2345_v60 = vrot.slane %v3683_v52, 1 }
 0x327   : > { %2312 = vrot.lane.b32.xlu1 %v3685_v16, %s2829_s26 }
 0x329   : > { %2314 = vrot.lane.b32.xlu0 %v3691_v18, %s2829_s26  ;;  %s2540_s26 = scalar_lea.sflag [#allocation5], %s377_s12 }
 0x32b   : > { %2388 = vrot.lane.b32.xlu1 %v2368_v26, %s2830_s29  ;;  %v3903_v26 = vld [vmem:[#allocation12_spill] sm:$0xff] }
 0x32d   : > { %2390 = vrot.lane.b32.xlu0 %v2369_v15, %s2830_s29  ;;  %v2447_v15 = vrot.slane %v3713_v4, %v3903_v26 }
 0x32f   : > { %2392 = vrot.lane.b32.xlu1 %v2370_v9, %s2830_s29 }
 0x331   : > { %2394 = vrot.lane.b32.xlu0 %v2371_v2, %s2830_s29  ;;  %v3904_v2 = vld [vmem:[#allocation15_spill] sm:$0xff]  ;;  %s2637_s29 = sshll.u32 %s377_s12, 3 }
 0x332   : > { %s379_s30 = scalar_lea.vmem [#allocation6], %s2637_s29 }
 0x333   : > { %s2554_s11 = sshll.u32 %s379_s30, 4  ;;  %s2555_s11 = int_to_ptr.vmem [resolvable:$true] %s2554_s11 }
 0x334   : > { %s2761_s21 = scalar_lea.vmem %s2555_s11, 128  ;;  %p2768_p11 = scmp.lt.s32.totalorder %s2555_s11, %s2766_s22 }
 0x335   : > { %p2762_p8 = scmp.ne.s32.totalorder %s2555_s11, %s2761_s21  ;;  %p2769_p12 = scmp.lt.s32.totalorder %s2767_s27, %s2761_s21 }
 0x337   : > { %p2763_p9 = pnand %p2762_p8, %p2930_p5  ;;  %p2770_p13 = por %p2769_p12, %p2768_p11 }
 0x339   : > { %p2764_p10 = pneg %p2763_p9 }
 0x33b   : > { %p2771_p0 = pnand %p2770_p13, %p2764_p10 }
 0x385   : > { %v2301_v45 = vpop.permute.xlu1 %2300 }
 0x387   : > { %v2303_v57 = vpop.permute.xlu0 %2302 }
 0x388   : > { %v2322_v35 = vsel %vm453_vm0, %v2301_v45, %v2303_v57 }
 0x389   : > { %v2305_v46 = vpop.permute.xlu1 %2304  ;;  %v2325_v21 = vmul.f32 %v2322_v35, %v3086_v36 }
 0x38a   : > { %v2321_v10 = vsel %vm453_vm0, %v2303_v57, %v2305_v46  ;;  %v2451_v57 = vrot.slane %v3713_v4, %v3904_v2 }
 0x38b   : > { %v2307_v5 = vpop.permute.xlu0 %2306  ;;  %v2326_v29 = vmul.f32 %v2321_v10, %v3103_v43  ;;  %v2357_v25 = vadd.f32 %v2341_v38, %v2325_v21 }
 0x38c   : > { %v2320_v27 = vsel %vm453_vm0, %v2305_v46, %v2307_v5 }
 0x38d   : > { %v3703_v34 = vpop.permute.xlu1 %2380  ;;  %v2358_v0 = vadd.f32 %v2342_v50, %v2326_v29  ;;  %v2327_v59 = vmul.f32 %v2320_v27, %v3091_v39  ;;  %v3906_v29 = vld [vmem:[#allocation23_spill] sm:$0xff] }
 0x38f   : > { %v2383_v17 = vpop.permute.xlu0 %2382  ;;  %v2359_v46 = vadd.f32 %v2343_v32, %v2327_v59  ;;  %v3908_v32 = vld [vmem:[#allocation24_spill] sm:$0xff] }
 0x390   : > { %v2402_v33 = vsel %vm527_vm1, %v3703_v34, %v2383_v17 }
 0x391   : > { %v2385_v40 = vpop.permute.xlu1 %2384 }
 0x392   : > { %v2401_v47 = vsel %vm527_vm1, %v2383_v17, %v2385_v40 }
 0x393   : > { %v2387_v54 = vpop.permute.xlu0 %2386  ;;  %v2405_v36 = vmul.f32 %v2401_v47, %v3896_v49 }
 0x394   : > { %v2400_v22 = vsel %vm527_vm1, %v2385_v40, %v2387_v54 }
 0x395   : > { %v2309_v62 = vpop.permute.xlu1 %2308  ;;  %v2406_v43 = vmul.f32 %v2400_v22, %v3897_v37  ;;  %v2347_v37 = vrot.slane %v3691_v18, 1  ;;  %v2413_v8 = vadd.f32 %v2405_v36, %v2357_v25 }
 0x396   : > { %v2319_v49 = vsel %vm453_vm0, %v2307_v5, %v2309_v62  ;;  %v2404_v5 = vmul.f32 %v2402_v33, %v3899_v24  ;;  %v3905_v24 = vld [vmem:[#allocation16_spill] sm:$0xff] }
 0x397   : > { %v2311_v14 = vpop.permute.xlu0 %2310  ;;  %v2414_v39 = vadd.f32 %v2406_v43, %v2358_v0  ;;  %v2328_v16 = vmul.f32 %v2319_v49, %v3144_v1  ;;  %v2423_v10 = vadd.f32 %v3729_v61, %v2413_v8 }
 0x398   : > { %v2318_v58 = vsel %vm453_vm0, %v2309_v62, %v2311_v14 }
 0x399   : > { %v2313_v12 = vpop.permute.xlu1 %2312  ;;  %v2329_v52 = vmul.f32 %v2318_v58, %v3147_v6  ;;  %v2424_v11 = vadd.f32 %v3729_v61, %v2414_v39  ;;  %v2360_v55 = vadd.f32 %v2344_v7, %v2328_v16  ;;  %v2473_v7 = vadd.f32 %v2439_v56, %v2423_v10 }
 0x39a   : > { %v2317_v1 = vsel %vm453_vm0, %v2311_v14, %v2313_v12 }
 0x39b   : > { %v2315_v3 = vpop.permute.xlu0 %2314  ;;  %v2474_v19 = vadd.f32 %v2443_v28, %v2424_v11 }
 0x39c   : > { %v2323_v48 = vsel %vm453_vm0, %v2315_v3, %v2301_v45 }
 0x39d   : > { %v2324_v18 = vmul.f32 %v2323_v48, %v3100_v42  ;;  %v2389_v9 = vpop.permute.xlu1 %2388  ;;  %v2316_v42 = vsel %vm453_vm0, %v2313_v12, %v2315_v3  ;;  %v3911_v48 = vld [vmem:[#allocation14_spill] sm:$0xff] }
 0x39e   : > { %v2399_v17 = vsel %vm527_vm1, %v2387_v54, %v2389_v9  ;;  %v2455_v54 = vrot.slane %v3713_v4, %v3905_v24  ;;  %v2331_v38 = vmul.f32 %v2316_v42, %v3907_v63  ;;  %v2459_v31 = vrot.slane %v3713_v4, %v3911_v48 }
 0x39f   : > { %v2356_v45 = vadd.f32 %v2340_v53, %v2324_v18  ;;  %v2407_v40 = vmul.f32 %v2399_v17, %v3898_v51  ;;  %v2391_v35 = vpop.permute.xlu0 %2390  ;;  %v2361_v53 = vadd.f32 %v2345_v60, %v2329_v52  ;;  %v2330_v51 = vmul.f32 %v2317_v1, %v3906_v29  ;;  %v3910_v60 = vld [vmem:[#allocation22_spill] sm:$0xff] }
 0x3a0   : > { %v2398_v6 = vsel %vm527_vm1, %v2389_v9, %v2391_v35  ;;  %v2363_v58 = vadd.f32 %v2347_v37, %v2331_v38 }
 0x3a1   : > { %v2412_v47 = vadd.f32 %v2404_v5, %v2356_v45  ;;  %v2415_v22 = vadd.f32 %v2407_v40, %v2359_v46  ;;  %v2408_v62 = vmul.f32 %v2398_v6, %v3158_v23  ;;  %v2393_v21 = vpop.permute.xlu1 %2392  ;;  %v2362_v33 = vadd.f32 %v2346_v41, %v2330_v51 }
 0x3a2   : > { %v2397_v50 = vsel %vm527_vm1, %v2391_v35, %v2393_v21 }
 0x3a3   : > { %v2422_v27 = vadd.f32 %v3729_v61, %v2412_v47  ;;  %v2425_v14 = vadd.f32 %v3729_v61, %v2415_v22  ;;  %v2416_v30 = vadd.f32 %v2408_v62, %v2360_v55  ;;  %v2409_v36 = vmul.f32 %v2397_v50, %v3908_v32  ;;  %v2395_v43 = vpop.permute.xlu0 %2394 }
 0x3a4   : > { %v2396_v23 = vsel %vm527_vm1, %v2393_v21, %v2395_v43  ;;  %v2403_v12 = vsel %vm527_vm1, %v2395_v43, %v3703_v34  ;;  %v3912_v34 = vld [vmem:[#allocation13_spill] sm:$0xff] }
 0x3a5   : > { %v2472_v25 = vadd.f32 %v2435_v20, %v2422_v27  ;;  %v2475_v0 = vadd.f32 %v2447_v15, %v2425_v14  ;;  %v2426_v59 = vadd.f32 %v3729_v61, %v2416_v30  ;;  %v2417_v49 = vadd.f32 %v2409_v36, %v2361_v53 }
 0x3a6   : > { %v2410_v3 = vmul.f32 %v2396_v23, %v3909_v44  ;;  %v2411_v56 = vmul.f32 %v2403_v12, %v3910_v60  ;;  %v2463_v20 = vrot.slane %v3713_v4, %v3912_v34 }
 0x3a7   : > { %v2488_v28 = vcombine.low %v2472_v25, %v2473_v7  ;;  %v2489_v8 = vcombine.low %v2474_v19, %v2475_v0  ;;  %v2427_v39 = vadd.f32 %v3729_v61, %v2417_v49  ;;  %v2476_v26 = vadd.f32 %v2451_v57, %v2426_v59 }
 0x3a8   : > { %v2418_v16 = vadd.f32 %v2410_v3, %v2362_v33  ;;  %v2419_v18 = vadd.f32 %v2411_v56, %v2363_v58 }
 0x3a9   : > { %v2498_v41 = vrot.slane %v2488_v28, %v3749_v13  ;;  %v2505_v37 = vrot.slane %v2489_v8, %v3749_v13  ;;  %v2477_v15 = vadd.f32 %v2455_v54, %v2427_v39 }
 0x3aa   : > { %v2428_v9 = vadd.f32 %v3729_v61, %v2418_v16  ;;  %v2429_v2 = vadd.f32 %v3729_v61, %v2419_v18 }
 0x3ab   : > { %v2490_v46 = vcombine.low %v2476_v26, %v2477_v15  ;;  %v2520_v5 = vcombine.low %v2498_v41, %v2505_v37 }
 0x3ac   : > { %v2478_v52 = vadd.f32 %v2459_v31, %v2428_v9  ;;  %v2479_v17 = vadd.f32 %v2463_v20, %v2429_v2 }
 0x3ad   : > { %v2512_v1 = vrot.slane %v2490_v46, %v3749_v13  ;;  %v2528_v57 = vrot.slane %v2520_v5, %v3749_v13 }
 0x3ae   : > { %v2491_v4 = vcombine.low %v2478_v52, %v2479_v17 }
 0x3b0   : > { %v2519_v42 = vrot.slane %v2491_v4, %v3749_v13 }
 0x3b2   : > { %v2521_v45 = vcombine.low %v2512_v1, %v2519_v42 }
 0x3b4   : > { %v2535_v61 = vrot.slane %v2521_v45, %v3749_v13 }
 0x3b6   : > { %v2536_v40 = vcombine.low %v2528_v57, %v2535_v61 }
 0x3b8   : > { %2538 = vst [vmem:[%s379_s30] sm:$0xff] %v2536_v40 }
 0x3b9   : > { %2774 = shalt.err (!%p2771_p0)
}
 0x3ba   : > { %s2775_s29 = scalar_lea.hbm %s2552_s19, 128  ;;  %s2779_s30 = scalar_lea.hbm %s3848_s10, 256 }
 0x3bb   : > { %p2776_p1 = scmp.ne.s32.totalorder %s2552_s19, %s2775_s29  ;;  %p2780_p4 = scmp.lt.s32.totalorder %s2552_s19, %s3848_s10 }
 0x3bc   : > { %p2781_p7 = scmp.lt.s32.totalorder %s2779_s30, %s2775_s29 }
 0x3bd   : > { %p2777_p2 = pnand %p2776_p1, %p2930_p5 }
 0x3be   : > { %p2782_p6 = por %p2781_p7, %p2780_p4 }
 0x3bf   : > { %p2778_p3 = pneg %p2777_p2 }
 0x3c1   : > { %p2783_p8 = pnand %p2782_p6, %p2778_p3 }
 0x3c3   : > { %2786 = shalt.err (!%p2783_p8)
}
 0x3c4   : > { %2682 = dma.vmem_to_hbm [thread:$0]  (%p2930_p5), %s2555_s11, 128, %s2552_s19, %s2540_s26  }
 0x3c5 PF: > { %p2694_p9 = scmp.ge.s32.totalorder %s2825_s18, 2  ;;  %s2566_s21 = sand.u32 1, %s2813_s15  }
 0x3c6   : > { %p3913_p10 = scmp.ne.s32.totalorder %s3875_s25, 0  ;;  %s2567_s9 = scalar_lea.sflag [#allocation5], %s2566_s21 }
 0x3c8   : > { %p2689_p11 = pnand %p2694_p9, %p3913_p10 }
 0x3ca   : > { %p2690_p12 = pneg %p2689_p11 }
 0x3cc   : > { %2808 = dma.done.wait (%p2690_p12), %s2567_s9, 128  }
 0x3cd   : > { %2810 = vsyncadd (%p2690_p12), %s2567_s9, 4294967168  ;;  %p22_p13 = scmp.ge.s32.totalorder %s2917_s20, 4   ;;  %s3914_s15 = smov %s2817_s16 }
 0x3ce   : > { %s3915_s16 = smov %s2821_s17  ;;  %s3916_s17 = smov %s2928_s23 }
 0x3cf   : > { %s3917_s18 = smov %s2917_s20  ;;  %24 = sbr.rel (!%p22_p13) target bundleno = 6 (0x6), region = 105 }
 0x3d4   :  { %2572 = vsyncpa [#allocation4], 1 }
 0x3d5   :  { %2574 = vsyncpa [#allocation4 + $0x1], 1 }
 0x3d6   :  { %2575 = vsyncpa [#allocation5], 1 }
 0x3d7   :  { %2577 = vsyncpa [#allocation5 + $0x1], 1 }

</bundles_post_ra>
